<compile_context>
chip_gen: v6e
topology: v6e:2x2x1
jax: 0.10.0
libtpu: 0.0.40
codegen_flags: <defaults>
</compile_context>

<pallas_src>
import functools
import math

import jax
import jax.numpy as jnp
from jax.experimental import pallas as pl
from jax.experimental.pallas import tpu as pltpu


# ----------------------------- positional encoding (host-side, plain JAX) ----------------------
def positional_encoding(n_embd: int, max_len: int) -> jnp.ndarray:
    position = jnp.arange(max_len, dtype=jnp.float32)[:, None]
    div_term = jnp.exp(
        jnp.arange(0, n_embd, 2, dtype=jnp.float32) * (-math.log(10000.0) / n_embd)
    )
    pe = jnp.zeros((max_len, n_embd), dtype=jnp.float32)
    pe = pe.at[:, 0::2].set(jnp.sin(position * div_term))
    pe = pe.at[:, 1::2].set(jnp.cos(position * div_term))
    return pe


# ----------------------------- fused kernel ----------------------------------------------------
def _layer_norm(x, w, b, eps):
    # biased variance, matches torch.nn.LayerNorm
    mu = jnp.mean(x, axis=-1, keepdims=True)
    xc = x - mu
    var = jnp.mean(xc * xc, axis=-1, keepdims=True)
    return xc * jax.lax.rsqrt(var + eps) * w + b


def fused_encoder_kernel(
    x_ref,
    wq_ref, bq_ref, wk_ref, bk_ref, wv_ref, bv_ref, wo_ref, bo_ref,
    ln1w_ref, ln1b_ref, ln2w_ref, ln2b_ref,
    w1_ref, b1_ref, w2_ref, b2_ref,
    o_ref,
    ctx_ref,
    *, nhead, eps, approx_recip,
):
    """One grid step = (batch tile, encoder layer).  o_ref holds the resident f32 activation."""
    layer = pl.program_id(1)
    batch_tile, seq_len, D = x_ref.shape
    hd = D // nhead
    rows = batch_tile * seq_len
    cd = wq_ref.dtype                       # MXU operand dtype (bf16 by default, f32 optional)

    # First layer for this batch tile: initialize the resident activation (PE already added on
    # the host, so x_ref is only consumed here).
    @pl.when(layer == 0)
    def _():
        o_ref[...] = x_ref[...]

    # Residual stream stays f32 and resident in the output VMEM block across the layer axis.
    x = o_ref[...].reshape(rows, D)

    # ---- self-attention block: x = x + out_proj(MHA(LN1(x))) ----
    xn = _layer_norm(x, ln1w_ref[...], ln1b_ref[...], eps).astype(cd)
    for h in range(nhead):                  # static, short loop; no activation lane slicing
        # Per-head projections (K = D full contraction depth; 1/sqrt(hd) pre-folded into wq/bq).
        qh = jnp.dot(xn, wq_ref[h], preferred_element_type=jnp.float32) + bq_ref[h]
        kh = jnp.dot(xn, wk_ref[h], preferred_element_type=jnp.float32) + bk_ref[h]
        vh = jnp.dot(xn, wv_ref[h], preferred_element_type=jnp.float32) + bv_ref[h]
        qh = qh.reshape(batch_tile, seq_len, hd).astype(cd)
        kh = kh.reshape(batch_tile, seq_len, hd).astype(cd)
        vh = vh.reshape(batch_tile, seq_len, hd).astype(cd)

        s = jnp.einsum("bqd,bkd->bqk", qh, kh, preferred_element_type=jnp.float32)
        s = s - jnp.max(s, axis=-1, keepdims=True)
        p = jnp.exp(s)
        p = p * pl.reciprocal(jnp.sum(p, axis=-1, keepdims=True), approx=approx_recip)
        ctx = jnp.einsum("bqk,bkd->bqd", p.astype(cd), vh,
                         preferred_element_type=jnp.float32)          # (bt, S, hd)
        # Assemble head contexts in a single (rows, D) compute-dtype buffer at lane offset h*hd.
        ctx_ref[:, h * hd:(h + 1) * hd] = ctx.reshape(rows, hd).astype(cd)

    # ONE output projection with full contraction depth K = D (replaces nhead small-K dots).
    attn = jnp.dot(ctx_ref[...], wo_ref[...], preferred_element_type=jnp.float32) + bo_ref[...]
    x = x + attn

    # ---- feed-forward block: x = x + W2 @ relu(W1 @ LN2(x)) ----
    xn2 = _layer_norm(x, ln2w_ref[...], ln2b_ref[...], eps).astype(cd)
    h1 = jnp.dot(xn2, w1_ref[...], preferred_element_type=jnp.float32) + b1_ref[...]
    h1 = jnp.maximum(h1, 0.0).astype(cd)    # ReLU, then drop to compute dtype immediately
    ff = jnp.dot(h1, w2_ref[...], preferred_element_type=jnp.float32) + b2_ref[...]
    x = x + ff

    o_ref[...] = x.reshape(batch_tile, seq_len, D).astype(o_ref.dtype)


# ----------------------------- parameters ------------------------------------------------------
def init_layer_params(key, d_model, dim_feedforward):
    """Parameters in PyTorch nn.TransformerEncoderLayer layout / shapes ([out, in] weights)."""
    D, F = d_model, dim_feedforward
    ks = jax.random.split(key, 4)
    s = 0.02
    return {
        "in_proj_weight": s * jax.random.normal(ks[0], (3 * D, D), jnp.float32),
        "in_proj_bias": jnp.zeros((3 * D,), jnp.float32),
        "out_proj_weight": s * jax.random.normal(ks[1], (D, D), jnp.float32),
        "out_proj_bias": jnp.zeros((D,), jnp.float32),
        "norm1_weight": jnp.ones((D,), jnp.float32),
        "norm1_bias": jnp.zeros((D,), jnp.float32),
        "norm2_weight": jnp.ones((D,), jnp.float32),
        "norm2_bias": jnp.zeros((D,), jnp.float32),
        "linear1_weight": s * jax.random.normal(ks[2], (F, D), jnp.float32),
        "linear1_bias": jnp.zeros((F,), jnp.float32),
        "linear2_weight": s * jax.random.normal(ks[3], (D, F), jnp.float32),
        "linear2_bias": jnp.zeros((D,), jnp.float32),
    }


def pack_params(layer_params, *, nhead, matmul_dtype=jnp.bfloat16):
    """Host-side repack: split fused QKV per head, transpose to [in, out], fold the 1/sqrt(hd)
    query scale into wq/bq, stack over layers.

    matmul_dtype: MXU operand / weight storage dtype.  bf16 is the default (halves weight DMA
    and VMEM; the MXU is bf16-native on v5e/v6e/v7x).  Accumulation, biases, LayerNorm params
    and the residual stream stay f32 inside the kernel.
    """
    D = layer_params[0]["out_proj_weight"].shape[0]
    assert D % nhead == 0
    hd = D // nhead
    q_scale = 1.0 / math.sqrt(hd)
    wd = matmul_dtype

    def heads_w(w2d):          # torch [out, in] (D, D) -> (nhead, D_in, hd) per-head [in, out]
        return w2d.reshape(nhead, hd, D).transpose(0, 2, 1)

    def heads_b(b1d):          # (D,) -> (nhead, 1, hd)
        return b1d.reshape(nhead, 1, hd)

    def stack(fn):
        return jnp.stack([fn(p) for p in layer_params], axis=0)

    return {
        "wq": stack(lambda p: (q_scale * heads_w(p["in_proj_weight"][0 * D:1 * D])).astype(wd)),
        "wk": stack(lambda p: heads_w(p["in_proj_weight"][1 * D:2 * D]).astype(wd)),
        "wv": stack(lambda p: heads_w(p["in_proj_weight"][2 * D:3 * D]).astype(wd)),
        "bq": stack(lambda p: (q_scale * heads_b(p["in_proj_bias"][0 * D:1 * D]))),
        "bk": stack(lambda p: heads_b(p["in_proj_bias"][1 * D:2 * D])),
        "bv": stack(lambda p: heads_b(p["in_proj_bias"][2 * D:3 * D])),
        "wo": stack(lambda p: p["out_proj_weight"].T.astype(wd)),            # (L, D, D)
        "bo": stack(lambda p: p["out_proj_bias"][None, :]),                  # (L, 1, D)
        "ln1w": stack(lambda p: p["norm1_weight"][None, :]),
        "ln1b": stack(lambda p: p["norm1_bias"][None, :]),
        "ln2w": stack(lambda p: p["norm2_weight"][None, :]),
        "ln2b": stack(lambda p: p["norm2_bias"][None, :]),
        "w1": stack(lambda p: p["linear1_weight"].T.astype(wd)),             # (L, D, F)
        "b1": stack(lambda p: p["linear1_bias"][None, :]),                   # (L, 1, F)
        "w2": stack(lambda p: p["linear2_weight"].T.astype(wd)),             # (L, F, D)
        "b2": stack(lambda p: p["linear2_bias"][None, :]),                   # (L, 1, D)
    }


# ----------------------------- VMEM budgeting --------------------------------------------------
def _vmem_bytes_estimate(batch_tile, S, D, F, w_itemsize):
    """Rough per-kernel VMEM footprint for one batch tile of the fused layer body."""
    rows = batch_tile * S
    act = rows * D * 4
    io = 3 * act                                                   # resident out + 2x x tile
    w_layer = (4 * D * D + 2 * D * F) * w_itemsize + (6 * D + F) * 4
    weights = 2 * w_layer                                          # double-buffered layer weights
    live = (4 * act                                                # x, xn, attn/ff, misc f32
            + rows * F * 4                                         # h1
            + batch_tile * S * S * 4                               # one head's f32 score block
            + rows * D * w_itemsize)                               # ctx scratch
    return io + weights + live


def _auto_batch_tile(B, S, D, F, w_itemsize, budget):
    best = 1
    for bt in range(1, B + 1):
        if B % bt == 0 and _vmem_bytes_estimate(bt, S, D, F, w_itemsize) <= budget:
            best = bt
    return best


# ----------------------------- wrapper ----------------------------------------------------------
def transformer_encoder(x, pe, packed, *, nhead, eps=1e-5, batch_tile=None,
                        approx_softmax_recip=False,
                        vmem_budget_bytes=44 * (1 << 20),
                        dimension_semantics=("parallel", "arbitrary")):
    """x: (B, S, D) embedded tokens; pe: (S, D); packed: output of pack_params.

    Output is always f32 (the residual stream is kept f32 across all layers).
    On v7x pass dimension_semantics=(pltpu.CORE_PARALLEL, pltpu.ARBITRARY) and batch_tile=B//2
    to shard batch tiles across the two TensorCores.
    """
    B, S, D = x.shape
    assert D % nhead == 0
    assert pe.shape == (S, D), "sequence length must equal max_len of the positional encoding"
    hd = D // nhead
    L = packed["wq"].shape[0]
    F = packed["w1"].shape[-1]
    w_dtype = packed["wq"].dtype
    w_itemsize = w_dtype.itemsize

    # Positional-encoding add done host-side (one cheap XLA elementwise add); also pins the
    # residual stream to f32 regardless of input / weight dtype.
    x_pe = x.astype(jnp.float32) + pe[None, :, :]

    if batch_tile is None:
        batch_tile = _auto_batch_tile(B, S, D, F, w_itemsize, vmem_budget_bytes)
    assert B % batch_tile == 0
    n_batch_tiles = B // batch_tile
    rows = batch_tile * S

    est = _vmem_bytes_estimate(batch_tile, S, D, F, w_itemsize)
    # Explicit scoped-VMEM limit: above the 16/32 MiB defaults, never above v7x's 64 MiB physical.
    vmem_limit = int(min(max(2 * est, 32 * (1 << 20)), 64 * (1 << 20)))

    kernel = functools.partial(fused_encoder_kernel, nhead=nhead, eps=eps,
                               approx_recip=approx_softmax_recip)

    def layer_block(shape):
        nd = len(shape)
        return pl.BlockSpec((None,) + tuple(shape), lambda bt_i, l, _n=nd: (l,) + (0,) * _n)

    in_specs = [
        # x is only read at layer 0 (its block index is constant along the layer axis).
        pl.BlockSpec((batch_tile, S, D), lambda bt_i, l: (bt_i, 0, 0)),
        layer_block((nhead, D, hd)), layer_block((nhead, 1, hd)),     # wq, bq (head-split)
        layer_block((nhead, D, hd)), layer_block((nhead, 1, hd)),     # wk, bk
        layer_block((nhead, D, hd)), layer_block((nhead, 1, hd)),     # wv, bv
        layer_block((D, D)), layer_block((1, D)),                     # wo, bo
        layer_block((1, D)), layer_block((1, D)),                     # norm1 w, b
        layer_block((1, D)), layer_block((1, D)),                     # norm2 w, b
        # If profiling shows exposed DMA at layer boundaries on v5e/v6e, give these two
        # (the largest tensors) pipeline_mode=pl.Buffered(3); avoid on v7x (64 MiB VMEM).
        layer_block((D, F)), layer_block((1, F)),                     # linear1 w, b
        layer_block((F, D)), layer_block((1, D)),                     # linear2 w, b
    ]

    return pl.pallas_call(
        kernel,
        out_shape=jax.ShapeDtypeStruct((B, S, D), jnp.float32),
        grid=(n_batch_tiles, L),
        in_specs=in_specs,
        out_specs=pl.BlockSpec((batch_tile, S, D), lambda bt_i, l: (bt_i, 0, 0)),
        scratch_shapes=[pltpu.VMEM((rows, D), w_dtype)],              # per-layer ctx assembly
        compiler_params=pltpu.CompilerParams(
            # Layer axis revisits the same output block (resident activation) -> arbitrary.
            dimension_semantics=dimension_semantics,
            vmem_limit_bytes=vmem_limit,
        ),
    )(
        x_pe,
        packed["wq"], packed["bq"], packed["wk"], packed["bk"],
        packed["wv"], packed["bv"], packed["wo"], packed["bo"],
        packed["ln1w"], packed["ln1b"], packed["ln2w"], packed["ln2b"],
        packed["w1"], packed["b1"], packed["w2"], packed["b2"],
    )


# ----------------------------- main -------------------------------------------------------------
if __name__ == "__main__":
    # small, module-consistent shapes (at real sizes keep d_model / dim_feedforward % 128 == 0)
    batch = 2
    max_len = 8           # sequence length == max_len (the PE add requires it, as in the module)
    d_model = 32
    n_encoder_layers = 2
    nhead = 4
    dim_feedforward = 64

    key = jax.random.PRNGKey(0)
    key_x, *key_layers = jax.random.split(key, n_encoder_layers + 1)

    x = jax.random.normal(key_x, (batch, max_len, d_model), jnp.float32)
    pe = positional_encoding(d_model, max_len)
    layer_params = [init_layer_params(k, d_model, dim_feedforward) for k in key_layers]

    # bf16 MXU operands by default on all generations; accumulation / LN / softmax / residual f32.
    packed = pack_params(layer_params, nhead=nhead)

    out = transformer_encoder(x, pe, packed, nhead=nhead, eps=1e-5)
    out = jax.block_until_ready(out)
    assert out.shape == (batch, max_len, d_model)
    assert bool(jnp.all(jnp.isfinite(out)))
    print("KERNEL_OK")
</pallas_src>

<mosaic_0001>
module attributes {stable_mosaic.version = 11 : i64} {
  func.func @fused_encoder_kernel(%arg0: i32, %arg1: i32, %arg2: memref<2x8x32xf32, #tpu.memory_space<vmem>>, %arg3: memref<1x4x32x8xbf16, #tpu.memory_space<vmem>>, %arg4: memref<1x4x1x8xf32, #tpu.memory_space<vmem>>, %arg5: memref<1x4x32x8xbf16, #tpu.memory_space<vmem>>, %arg6: memref<1x4x1x8xf32, #tpu.memory_space<vmem>>, %arg7: memref<1x4x32x8xbf16, #tpu.memory_space<vmem>>, %arg8: memref<1x4x1x8xf32, #tpu.memory_space<vmem>>, %arg9: memref<1x32x32xbf16, #tpu.memory_space<vmem>>, %arg10: memref<1x1x32xf32, #tpu.memory_space<vmem>>, %arg11: memref<1x1x32xf32, #tpu.memory_space<vmem>>, %arg12: memref<1x1x32xf32, #tpu.memory_space<vmem>>, %arg13: memref<1x1x32xf32, #tpu.memory_space<vmem>>, %arg14: memref<1x1x32xf32, #tpu.memory_space<vmem>>, %arg15: memref<1x32x64xbf16, #tpu.memory_space<vmem>>, %arg16: memref<1x1x64xf32, #tpu.memory_space<vmem>>, %arg17: memref<1x64x32xbf16, #tpu.memory_space<vmem>>, %arg18: memref<1x1x32xf32, #tpu.memory_space<vmem>>, %arg19: memref<2x8x32xf32, #tpu.memory_space<vmem>>, %arg20: memref<16x32xbf16, #tpu.memory_space<vmem>>) attributes {dimension_semantics = [#tpu.dimension_semantics<parallel>, #tpu.dimension_semantics<arbitrary>], iteration_bounds = array<i64: 1, 2>, scalar_prefetch = 0 : i64, scratch_operands = 1 : i64, tpu.core_type = #tpu.core_type<tc>, window_params = [{transform_indices = @transform_0, window_bounds = array<i64: 2, 8, 32>}, {transform_indices = @transform_1, window_bounds = array<i64: 1, 4, 32, 8>}, {transform_indices = @transform_2, window_bounds = array<i64: 1, 4, 1, 8>}, {transform_indices = @transform_3, window_bounds = array<i64: 1, 4, 32, 8>}, {transform_indices = @transform_4, window_bounds = array<i64: 1, 4, 1, 8>}, {transform_indices = @transform_5, window_bounds = array<i64: 1, 4, 32, 8>}, {transform_indices = @transform_6, window_bounds = array<i64: 1, 4, 1, 8>}, {transform_indices = @transform_7, window_bounds = array<i64: 1, 32, 32>}, {transform_indices = @transform_8, window_bounds = array<i64: 1, 1, 32>}, {transform_indices = @transform_9, window_bounds = array<i64: 1, 1, 32>}, {transform_indices = @transform_10, window_bounds = array<i64: 1, 1, 32>}, {transform_indices = @transform_11, window_bounds = array<i64: 1, 1, 32>}, {transform_indices = @transform_12, window_bounds = array<i64: 1, 1, 32>}, {transform_indices = @transform_13, window_bounds = array<i64: 1, 32, 64>}, {transform_indices = @transform_14, window_bounds = array<i64: 1, 1, 64>}, {transform_indices = @transform_15, window_bounds = array<i64: 1, 64, 32>}, {transform_indices = @transform_16, window_bounds = array<i64: 1, 1, 32>}, {transform_indices = @transform_17, window_bounds = array<i64: 2, 8, 32>}]} {
    %c0_i32 = arith.constant 0 : i32
    %0 = arith.cmpi eq, %arg1, %c0_i32 : i32
    %1 = arith.extui %0 : i1 to i32
    %c0_i32_0 = arith.constant 0 : i32
    %2 = arith.cmpi ne, %1, %c0_i32_0 : i32
    scf.if %2 {
      %c0_177 = arith.constant 0 : index
      %c0_178 = arith.constant 0 : index
      %c0_179 = arith.constant 0 : index
      %256 = vector.load %arg2[%c0_177, %c0_178, %c0_179] : memref<2x8x32xf32, #tpu.memory_space<vmem>>, vector<2x8x32xf32>
      %c0_180 = arith.constant 0 : index
      %c0_181 = arith.constant 0 : index
      %c0_182 = arith.constant 0 : index
      %257 = vector.load %arg19[%c0_180, %c0_181, %c0_182] : memref<2x8x32xf32, #tpu.memory_space<vmem>>, vector<2x8x32xf32>
      tpu.vector_store %arg19[%c0_180, %c0_181, %c0_182], %256 {strides = array<i32>} : memref<2x8x32xf32, #tpu.memory_space<vmem>>, vector<2x8x32xf32>,
    } else {
    }
    %c0 = arith.constant 0 : index
    %c0_1 = arith.constant 0 : index
    %c0_2 = arith.constant 0 : index
    %3 = vector.load %arg19[%c0, %c0_1, %c0_2] : memref<2x8x32xf32, #tpu.memory_space<vmem>>, vector<2x8x32xf32>
    %4 = vector.shape_cast %3 : vector<2x8x32xf32> to vector<16x32xf32>
    %c0_3 = arith.constant 0 : index
    %c0_4 = arith.constant 0 : index
    %c0_5 = arith.constant 0 : index
    %5 = vector.load %arg11[%c0_3, %c0_4, %c0_5] : memref<1x1x32xf32, #tpu.memory_space<vmem>>, vector<1x1x32xf32>
    %6 = vector.shape_cast %5 : vector<1x1x32xf32> to vector<1x32xf32>
    %c0_6 = arith.constant 0 : index
    %c0_7 = arith.constant 0 : index
    %c0_8 = arith.constant 0 : index
    %7 = vector.load %arg12[%c0_6, %c0_7, %c0_8] : memref<1x1x32xf32, #tpu.memory_space<vmem>>, vector<1x1x32xf32>
    %8 = vector.shape_cast %7 : vector<1x1x32xf32> to vector<1x32xf32>
    %cst = arith.constant dense<0.000000e+00> : vector<16xf32>
    %9 = vector.multi_reduction <add>, %4, %cst [1] : vector<16x32xf32> to vector<16xf32>
    %10 = vector.shape_cast %9 : vector<16xf32> to vector<16x1xf32>
    %cst_9 = arith.constant 3.200000e+01 : f32
    %11 = vector.broadcast %cst_9 : f32 to vector<16x1xf32>
    %12 = arith.divf %10, %11 : vector<16x1xf32>
    %13 = vector.broadcast %12 : vector<16x1xf32> to vector<16x32xf32>
    %14 = arith.subf %4, %13 : vector<16x32xf32>
    %15 = arith.mulf %14, %14 : vector<16x32xf32>
    %cst_10 = arith.constant dense<0.000000e+00> : vector<16xf32>
    %16 = vector.multi_reduction <add>, %15, %cst_10 [1] : vector<16x32xf32> to vector<16xf32>
    %17 = vector.shape_cast %16 : vector<16xf32> to vector<16x1xf32>
    %cst_11 = arith.constant 3.200000e+01 : f32
    %18 = vector.broadcast %cst_11 : f32 to vector<16x1xf32>
    %19 = arith.divf %17, %18 : vector<16x1xf32>
    %cst_12 = arith.constant 9.99999974E-6 : f32
    %20 = vector.broadcast %cst_12 : f32 to vector<16x1xf32>
    %21 = arith.addf %19, %20 : vector<16x1xf32>
    %22 = math.rsqrt %21 : vector<16x1xf32>
    %23 = vector.broadcast %22 : vector<16x1xf32> to vector<16x32xf32>
    %24 = arith.mulf %14, %23 : vector<16x32xf32>
    %25 = vector.broadcast %6 : vector<1x32xf32> to vector<16x32xf32>
    %26 = arith.mulf %24, %25 : vector<16x32xf32>
    %27 = vector.broadcast %8 : vector<1x32xf32> to vector<16x32xf32>
    %28 = arith.addf %26, %27 : vector<16x32xf32>
    %29 = arith.truncf %28 : vector<16x32xf32> to vector<16x32xbf16>
    %c0_13 = arith.constant 0 : index
    %c0_14 = arith.constant 0 : index
    %c0_15 = arith.constant 0 : index
    %c0_16 = arith.constant 0 : index
    %30 = vector.load %arg3[%c0_13, %c0_14, %c0_15, %c0_16] : memref<1x4x32x8xbf16, #tpu.memory_space<vmem>>, vector<1x1x32x8xbf16>
    %31 = vector.shape_cast %30 : vector<1x1x32x8xbf16> to vector<32x8xbf16>
    %cst_17 = arith.constant dense<0.000000e+00> : vector<16x8xf32>
    %32 = tpu.matmul %29, %31, %cst_17 {dimension_numbers = #tpu.dot_dimension_numbers<[1], [0], [0], [1], [0, 0, 1, 1], [], []>} : vector<16x32xbf16>, vector<32x8xbf16>, vector<16x8xf32> -> vector<16x8xf32>
    %c0_18 = arith.constant 0 : index
    %c0_19 = arith.constant 0 : index
    %c0_20 = arith.constant 0 : index
    %c0_21 = arith.constant 0 : index
    %33 = vector.load %arg4[%c0_18, %c0_19, %c0_20, %c0_21] : memref<1x4x1x8xf32, #tpu.memory_space<vmem>>, vector<1x1x1x8xf32>
    %34 = vector.shape_cast %33 : vector<1x1x1x8xf32> to vector<1x8xf32>
    %35 = vector.broadcast %34 : vector<1x8xf32> to vector<16x8xf32>
    %36 = arith.addf %32, %35 : vector<16x8xf32>
    %c0_22 = arith.constant 0 : index
    %c0_23 = arith.constant 0 : index
    %c0_24 = arith.constant 0 : index
    %c0_25 = arith.constant 0 : index
    %37 = vector.load %arg5[%c0_22, %c0_23, %c0_24, %c0_25] : memref<1x4x32x8xbf16, #tpu.memory_space<vmem>>, vector<1x1x32x8xbf16>
    %38 = vector.shape_cast %37 : vector<1x1x32x8xbf16> to vector<32x8xbf16>
    %cst_26 = arith.constant dense<0.000000e+00> : vector<16x8xf32>
    %39 = tpu.matmul %29, %38, %cst_26 {dimension_numbers = #tpu.dot_dimension_numbers<[1], [0], [0], [1], [0, 0, 1, 1], [], []>} : vector<16x32xbf16>, vector<32x8xbf16>, vector<16x8xf32> -> vector<16x8xf32>
    %c0_27 = arith.constant 0 : index
    %c0_28 = arith.constant 0 : index
    %c0_29 = arith.constant 0 : index
    %c0_30 = arith.constant 0 : index
    %40 = vector.load %arg6[%c0_27, %c0_28, %c0_29, %c0_30] : memref<1x4x1x8xf32, #tpu.memory_space<vmem>>, vector<1x1x1x8xf32>
    %41 = vector.shape_cast %40 : vector<1x1x1x8xf32> to vector<1x8xf32>
    %42 = vector.broadcast %41 : vector<1x8xf32> to vector<16x8xf32>
    %43 = arith.addf %39, %42 : vector<16x8xf32>
    %c0_31 = arith.constant 0 : index
    %c0_32 = arith.constant 0 : index
    %c0_33 = arith.constant 0 : index
    %c0_34 = arith.constant 0 : index
    %44 = vector.load %arg7[%c0_31, %c0_32, %c0_33, %c0_34] : memref<1x4x32x8xbf16, #tpu.memory_space<vmem>>, vector<1x1x32x8xbf16>
    %45 = vector.shape_cast %44 : vector<1x1x32x8xbf16> to vector<32x8xbf16>
    %cst_35 = arith.constant dense<0.000000e+00> : vector<16x8xf32>
    %46 = tpu.matmul %29, %45, %cst_35 {dimension_numbers = #tpu.dot_dimension_numbers<[1], [0], [0], [1], [0, 0, 1, 1], [], []>} : vector<16x32xbf16>, vector<32x8xbf16>, vector<16x8xf32> -> vector<16x8xf32>
    %c0_36 = arith.constant 0 : index
    %c0_37 = arith.constant 0 : index
    %c0_38 = arith.constant 0 : index
    %c0_39 = arith.constant 0 : index
    %47 = vector.load %arg8[%c0_36, %c0_37, %c0_38, %c0_39] : memref<1x4x1x8xf32, #tpu.memory_space<vmem>>, vector<1x1x1x8xf32>
    %48 = vector.shape_cast %47 : vector<1x1x1x8xf32> to vector<1x8xf32>
    %49 = vector.broadcast %48 : vector<1x8xf32> to vector<16x8xf32>
    %50 = arith.addf %46, %49 : vector<16x8xf32>
    %51 = vector.shape_cast %36 : vector<16x8xf32> to vector<2x8x8xf32>
    %52 = arith.truncf %51 : vector<2x8x8xf32> to vector<2x8x8xbf16>
    %53 = vector.shape_cast %43 : vector<16x8xf32> to vector<2x8x8xf32>
    %54 = arith.truncf %53 : vector<2x8x8xf32> to vector<2x8x8xbf16>
    %55 = vector.shape_cast %50 : vector<16x8xf32> to vector<2x8x8xf32>
    %56 = arith.truncf %55 : vector<2x8x8xf32> to vector<2x8x8xbf16>
    "tpu.trace_start"() <{level = 10 : i32, message = "bqd,bkd->bqk"}> : () -> ()
    %cst_40 = arith.constant dense<0.000000e+00> : vector<2x8x8xf32>
    %57 = tpu.matmul %52, %54, %cst_40 {dimension_numbers = #tpu.dot_dimension_numbers<[2], [2], [1], [1], [0, 0, 0, 1, 1, 1], [0], [0]>} : vector<2x8x8xbf16>, vector<2x8x8xbf16>, vector<2x8x8xf32> -> vector<2x8x8xf32>
    "tpu.trace_stop"() : () -> ()
    %cst_41 = arith.constant dense<0xFF800000> : vector<2x8xf32>
    %58 = vector.multi_reduction <maximumf>, %57, %cst_41 [2] : vector<2x8x8xf32> to vector<2x8xf32>
    %59 = vector.shape_cast %58 : vector<2x8xf32> to vector<2x8x1xf32>
    %60 = vector.broadcast %59 : vector<2x8x1xf32> to vector<2x8x8xf32>
    %61 = arith.subf %57, %60 : vector<2x8x8xf32>
    %62 = math.exp %61 : vector<2x8x8xf32>
    %cst_42 = arith.constant dense<0.000000e+00> : vector<2x8xf32>
    %63 = vector.multi_reduction <add>, %62, %cst_42 [2] : vector<2x8x8xf32> to vector<2x8xf32>
    %64 = vector.shape_cast %63 : vector<2x8xf32> to vector<2x8x1xf32>
    %65 = tpu.reciprocal %64 : vector<2x8x1xf32> -> vector<2x8x1xf32>
    %66 = vector.broadcast %65 : vector<2x8x1xf32> to vector<2x8x8xf32>
    %67 = arith.mulf %62, %66 : vector<2x8x8xf32>
    %68 = arith.truncf %67 : vector<2x8x8xf32> to vector<2x8x8xbf16>
    "tpu.trace_start"() <{level = 10 : i32, message = "bqk,bkd->bqd"}> : () -> ()
    %cst_43 = arith.constant dense<0.000000e+00> : vector<2x8x8xf32>
    %69 = tpu.matmul %68, %56, %cst_43 {dimension_numbers = #tpu.dot_dimension_numbers<[2], [1], [1], [2], [0, 0, 0, 1, 1, 2], [0], [0]>} : vector<2x8x8xbf16>, vector<2x8x8xbf16>, vector<2x8x8xf32> -> vector<2x8x8xf32>
    "tpu.trace_stop"() : () -> ()
    %70 = vector.shape_cast %69 : vector<2x8x8xf32> to vector<16x8xf32>
    %71 = arith.truncf %70 : vector<16x8xf32> to vector<16x8xbf16>
    %c0_44 = arith.constant 0 : index
    %c0_45 = arith.constant 0 : index
    %72 = vector.load %arg20[%c0_44, %c0_45] : memref<16x32xbf16, #tpu.memory_space<vmem>>, vector<16x8xbf16>
    tpu.vector_store %arg20[%c0_44, %c0_45], %71 {strides = array<i32>} : memref<16x32xbf16, #tpu.memory_space<vmem>>, vector<16x8xbf16>,
    %c0_46 = arith.constant 0 : index
    %c1 = arith.constant 1 : index
    %c0_47 = arith.constant 0 : index
    %c0_48 = arith.constant 0 : index
    %73 = vector.load %arg3[%c0_46, %c1, %c0_47, %c0_48] : memref<1x4x32x8xbf16, #tpu.memory_space<vmem>>, vector<1x1x32x8xbf16>
    %74 = vector.shape_cast %73 : vector<1x1x32x8xbf16> to vector<32x8xbf16>
    %cst_49 = arith.constant dense<0.000000e+00> : vector<16x8xf32>
    %75 = tpu.matmul %29, %74, %cst_49 {dimension_numbers = #tpu.dot_dimension_numbers<[1], [0], [0], [1], [0, 0, 1, 1], [], []>} : vector<16x32xbf16>, vector<32x8xbf16>, vector<16x8xf32> -> vector<16x8xf32>
    %c0_50 = arith.constant 0 : index
    %c1_51 = arith.constant 1 : index
    %c0_52 = arith.constant 0 : index
    %c0_53 = arith.constant 0 : index
    %76 = vector.load %arg4[%c0_50, %c1_51, %c0_52, %c0_53] : memref<1x4x1x8xf32, #tpu.memory_space<vmem>>, vector<1x1x1x8xf32>
    %77 = vector.shape_cast %76 : vector<1x1x1x8xf32> to vector<1x8xf32>
    %78 = vector.broadcast %77 : vector<1x8xf32> to vector<16x8xf32>
    %79 = arith.addf %75, %78 : vector<16x8xf32>
    %c0_54 = arith.constant 0 : index
    %c1_55 = arith.constant 1 : index
    %c0_56 = arith.constant 0 : index
    %c0_57 = arith.constant 0 : index
    %80 = vector.load %arg5[%c0_54, %c1_55, %c0_56, %c0_57] : memref<1x4x32x8xbf16, #tpu.memory_space<vmem>>, vector<1x1x32x8xbf16>
    %81 = vector.shape_cast %80 : vector<1x1x32x8xbf16> to vector<32x8xbf16>
    %cst_58 = arith.constant dense<0.000000e+00> : vector<16x8xf32>
    %82 = tpu.matmul %29, %81, %cst_58 {dimension_numbers = #tpu.dot_dimension_numbers<[1], [0], [0], [1], [0, 0, 1, 1], [], []>} : vector<16x32xbf16>, vector<32x8xbf16>, vector<16x8xf32> -> vector<16x8xf32>
    %c0_59 = arith.constant 0 : index
    %c1_60 = arith.constant 1 : index
    %c0_61 = arith.constant 0 : index
    %c0_62 = arith.constant 0 : index
    %83 = vector.load %arg6[%c0_59, %c1_60, %c0_61, %c0_62] : memref<1x4x1x8xf32, #tpu.memory_space<vmem>>, vector<1x1x1x8xf32>
    %84 = vector.shape_cast %83 : vector<1x1x1x8xf32> to vector<1x8xf32>
    %85 = vector.broadcast %84 : vector<1x8xf32> to vector<16x8xf32>
    %86 = arith.addf %82, %85 : vector<16x8xf32>
    %c0_63 = arith.constant 0 : index
    %c1_64 = arith.constant 1 : index
    %c0_65 = arith.constant 0 : index
    %c0_66 = arith.constant 0 : index
    %87 = vector.load %arg7[%c0_63, %c1_64, %c0_65, %c0_66] : memref<1x4x32x8xbf16, #tpu.memory_space<vmem>>, vector<1x1x32x8xbf16>
    %88 = vector.shape_cast %87 : vector<1x1x32x8xbf16> to vector<32x8xbf16>
    %cst_67 = arith.constant dense<0.000000e+00> : vector<16x8xf32>
    %89 = tpu.matmul %29, %88, %cst_67 {dimension_numbers = #tpu.dot_dimension_numbers<[1], [0], [0], [1], [0, 0, 1, 1], [], []>} : vector<16x32xbf16>, vector<32x8xbf16>, vector<16x8xf32> -> vector<16x8xf32>
    %c0_68 = arith.constant 0 : index
    %c1_69 = arith.constant 1 : index
    %c0_70 = arith.constant 0 : index
    %c0_71 = arith.constant 0 : index
    %90 = vector.load %arg8[%c0_68, %c1_69, %c0_70, %c0_71] : memref<1x4x1x8xf32, #tpu.memory_space<vmem>>, vector<1x1x1x8xf32>
    %91 = vector.shape_cast %90 : vector<1x1x1x8xf32> to vector<1x8xf32>
    %92 = vector.broadcast %91 : vector<1x8xf32> to vector<16x8xf32>
    %93 = arith.addf %89, %92 : vector<16x8xf32>
    %94 = vector.shape_cast %79 : vector<16x8xf32> to vector<2x8x8xf32>
    %95 = arith.truncf %94 : vector<2x8x8xf32> to vector<2x8x8xbf16>
    %96 = vector.shape_cast %86 : vector<16x8xf32> to vector<2x8x8xf32>
    %97 = arith.truncf %96 : vector<2x8x8xf32> to vector<2x8x8xbf16>
    %98 = vector.shape_cast %93 : vector<16x8xf32> to vector<2x8x8xf32>
    %99 = arith.truncf %98 : vector<2x8x8xf32> to vector<2x8x8xbf16>
    "tpu.trace_start"() <{level = 10 : i32, message = "bqd,bkd->bqk"}> : () -> ()
    %cst_72 = arith.constant dense<0.000000e+00> : vector<2x8x8xf32>
    %100 = tpu.matmul %95, %97, %cst_72 {dimension_numbers = #tpu.dot_dimension_numbers<[2], [2], [1], [1], [0, 0, 0, 1, 1, 1], [0], [0]>} : vector<2x8x8xbf16>, vector<2x8x8xbf16>, vector<2x8x8xf32> -> vector<2x8x8xf32>
    "tpu.trace_stop"() : () -> ()
    %cst_73 = arith.constant dense<0xFF800000> : vector<2x8xf32>
    %101 = vector.multi_reduction <maximumf>, %100, %cst_73 [2] : vector<2x8x8xf32> to vector<2x8xf32>
    %102 = vector.shape_cast %101 : vector<2x8xf32> to vector<2x8x1xf32>
    %103 = vector.broadcast %102 : vector<2x8x1xf32> to vector<2x8x8xf32>
    %104 = arith.subf %100, %103 : vector<2x8x8xf32>
    %105 = math.exp %104 : vector<2x8x8xf32>
    %cst_74 = arith.constant dense<0.000000e+00> : vector<2x8xf32>
    %106 = vector.multi_reduction <add>, %105, %cst_74 [2] : vector<2x8x8xf32> to vector<2x8xf32>
    %107 = vector.shape_cast %106 : vector<2x8xf32> to vector<2x8x1xf32>
    %108 = tpu.reciprocal %107 : vector<2x8x1xf32> -> vector<2x8x1xf32>
    %109 = vector.broadcast %108 : vector<2x8x1xf32> to vector<2x8x8xf32>
    %110 = arith.mulf %105, %109 : vector<2x8x8xf32>
    %111 = arith.truncf %110 : vector<2x8x8xf32> to vector<2x8x8xbf16>
    "tpu.trace_start"() <{level = 10 : i32, message = "bqk,bkd->bqd"}> : () -> ()
    %cst_75 = arith.constant dense<0.000000e+00> : vector<2x8x8xf32>
    %112 = tpu.matmul %111, %99, %cst_75 {dimension_numbers = #tpu.dot_dimension_numbers<[2], [1], [1], [2], [0, 0, 0, 1, 1, 2], [0], [0]>} : vector<2x8x8xbf16>, vector<2x8x8xbf16>, vector<2x8x8xf32> -> vector<2x8x8xf32>
    "tpu.trace_stop"() : () -> ()
    %113 = vector.shape_cast %112 : vector<2x8x8xf32> to vector<16x8xf32>
    %114 = arith.truncf %113 : vector<16x8xf32> to vector<16x8xbf16>
    %c0_76 = arith.constant 0 : index
    %c8 = arith.constant 8 : index
    %115 = vector.load %arg20[%c0_76, %c8] : memref<16x32xbf16, #tpu.memory_space<vmem>>, vector<16x8xbf16>
    tpu.vector_store %arg20[%c0_76, %c8], %114 {strides = array<i32>} : memref<16x32xbf16, #tpu.memory_space<vmem>>, vector<16x8xbf16>,
    %c0_77 = arith.constant 0 : index
    %c2 = arith.constant 2 : index
    %c0_78 = arith.constant 0 : index
    %c0_79 = arith.constant 0 : index
    %116 = vector.load %arg3[%c0_77, %c2, %c0_78, %c0_79] : memref<1x4x32x8xbf16, #tpu.memory_space<vmem>>, vector<1x1x32x8xbf16>
    %117 = vector.shape_cast %116 : vector<1x1x32x8xbf16> to vector<32x8xbf16>
    %cst_80 = arith.constant dense<0.000000e+00> : vector<16x8xf32>
    %118 = tpu.matmul %29, %117, %cst_80 {dimension_numbers = #tpu.dot_dimension_numbers<[1], [0], [0], [1], [0, 0, 1, 1], [], []>} : vector<16x32xbf16>, vector<32x8xbf16>, vector<16x8xf32> -> vector<16x8xf32>
    %c0_81 = arith.constant 0 : index
    %c2_82 = arith.constant 2 : index
    %c0_83 = arith.constant 0 : index
    %c0_84 = arith.constant 0 : index
    %119 = vector.load %arg4[%c0_81, %c2_82, %c0_83, %c0_84] : memref<1x4x1x8xf32, #tpu.memory_space<vmem>>, vector<1x1x1x8xf32>
    %120 = vector.shape_cast %119 : vector<1x1x1x8xf32> to vector<1x8xf32>
    %121 = vector.broadcast %120 : vector<1x8xf32> to vector<16x8xf32>
    %122 = arith.addf %118, %121 : vector<16x8xf32>
    %c0_85 = arith.constant 0 : index
    %c2_86 = arith.constant 2 : index
    %c0_87 = arith.constant 0 : index
    %c0_88 = arith.constant 0 : index
    %123 = vector.load %arg5[%c0_85, %c2_86, %c0_87, %c0_88] : memref<1x4x32x8xbf16, #tpu.memory_space<vmem>>, vector<1x1x32x8xbf16>
    %124 = vector.shape_cast %123 : vector<1x1x32x8xbf16> to vector<32x8xbf16>
    %cst_89 = arith.constant dense<0.000000e+00> : vector<16x8xf32>
    %125 = tpu.matmul %29, %124, %cst_89 {dimension_numbers = #tpu.dot_dimension_numbers<[1], [0], [0], [1], [0, 0, 1, 1], [], []>} : vector<16x32xbf16>, vector<32x8xbf16>, vector<16x8xf32> -> vector<16x8xf32>
    %c0_90 = arith.constant 0 : index
    %c2_91 = arith.constant 2 : index
    %c0_92 = arith.constant 0 : index
    %c0_93 = arith.constant 0 : index
    %126 = vector.load %arg6[%c0_90, %c2_91, %c0_92, %c0_93] : memref<1x4x1x8xf32, #tpu.memory_space<vmem>>, vector<1x1x1x8xf32>
    %127 = vector.shape_cast %126 : vector<1x1x1x8xf32> to vector<1x8xf32>
    %128 = vector.broadcast %127 : vector<1x8xf32> to vector<16x8xf32>
    %129 = arith.addf %125, %128 : vector<16x8xf32>
    %c0_94 = arith.constant 0 : index
    %c2_95 = arith.constant 2 : index
    %c0_96 = arith.constant 0 : index
    %c0_97 = arith.constant 0 : index
    %130 = vector.load %arg7[%c0_94, %c2_95, %c0_96, %c0_97] : memref<1x4x32x8xbf16, #tpu.memory_space<vmem>>, vector<1x1x32x8xbf16>
    %131 = vector.shape_cast %130 : vector<1x1x32x8xbf16> to vector<32x8xbf16>
    %cst_98 = arith.constant dense<0.000000e+00> : vector<16x8xf32>
    %132 = tpu.matmul %29, %131, %cst_98 {dimension_numbers = #tpu.dot_dimension_numbers<[1], [0], [0], [1], [0, 0, 1, 1], [], []>} : vector<16x32xbf16>, vector<32x8xbf16>, vector<16x8xf32> -> vector<16x8xf32>
    %c0_99 = arith.constant 0 : index
    %c2_100 = arith.constant 2 : index
    %c0_101 = arith.constant 0 : index
    %c0_102 = arith.constant 0 : index
    %133 = vector.load %arg8[%c0_99, %c2_100, %c0_101, %c0_102] : memref<1x4x1x8xf32, #tpu.memory_space<vmem>>, vector<1x1x1x8xf32>
    %134 = vector.shape_cast %133 : vector<1x1x1x8xf32> to vector<1x8xf32>
    %135 = vector.broadcast %134 : vector<1x8xf32> to vector<16x8xf32>
    %136 = arith.addf %132, %135 : vector<16x8xf32>
    %137 = vector.shape_cast %122 : vector<16x8xf32> to vector<2x8x8xf32>
    %138 = arith.truncf %137 : vector<2x8x8xf32> to vector<2x8x8xbf16>
    %139 = vector.shape_cast %129 : vector<16x8xf32> to vector<2x8x8xf32>
    %140 = arith.truncf %139 : vector<2x8x8xf32> to vector<2x8x8xbf16>
    %141 = vector.shape_cast %136 : vector<16x8xf32> to vector<2x8x8xf32>
    %142 = arith.truncf %141 : vector<2x8x8xf32> to vector<2x8x8xbf16>
    "tpu.trace_start"() <{level = 10 : i32, message = "bqd,bkd->bqk"}> : () -> ()
    %cst_103 = arith.constant dense<0.000000e+00> : vector<2x8x8xf32>
    %143 = tpu.matmul %138, %140, %cst_103 {dimension_numbers = #tpu.dot_dimension_numbers<[2], [2], [1], [1], [0, 0, 0, 1, 1, 1], [0], [0]>} : vector<2x8x8xbf16>, vector<2x8x8xbf16>, vector<2x8x8xf32> -> vector<2x8x8xf32>
    "tpu.trace_stop"() : () -> ()
    %cst_104 = arith.constant dense<0xFF800000> : vector<2x8xf32>
    %144 = vector.multi_reduction <maximumf>, %143, %cst_104 [2] : vector<2x8x8xf32> to vector<2x8xf32>
    %145 = vector.shape_cast %144 : vector<2x8xf32> to vector<2x8x1xf32>
    %146 = vector.broadcast %145 : vector<2x8x1xf32> to vector<2x8x8xf32>
    %147 = arith.subf %143, %146 : vector<2x8x8xf32>
    %148 = math.exp %147 : vector<2x8x8xf32>
    %cst_105 = arith.constant dense<0.000000e+00> : vector<2x8xf32>
    %149 = vector.multi_reduction <add>, %148, %cst_105 [2] : vector<2x8x8xf32> to vector<2x8xf32>
    %150 = vector.shape_cast %149 : vector<2x8xf32> to vector<2x8x1xf32>
    %151 = tpu.reciprocal %150 : vector<2x8x1xf32> -> vector<2x8x1xf32>
    %152 = vector.broadcast %151 : vector<2x8x1xf32> to vector<2x8x8xf32>
    %153 = arith.mulf %148, %152 : vector<2x8x8xf32>
    %154 = arith.truncf %153 : vector<2x8x8xf32> to vector<2x8x8xbf16>
    "tpu.trace_start"() <{level = 10 : i32, message = "bqk,bkd->bqd"}> : () -> ()
    %cst_106 = arith.constant dense<0.000000e+00> : vector<2x8x8xf32>
    %155 = tpu.matmul %154, %142, %cst_106 {dimension_numbers = #tpu.dot_dimension_numbers<[2], [1], [1], [2], [0, 0, 0, 1, 1, 2], [0], [0]>} : vector<2x8x8xbf16>, vector<2x8x8xbf16>, vector<2x8x8xf32> -> vector<2x8x8xf32>
    "tpu.trace_stop"() : () -> ()
    %156 = vector.shape_cast %155 : vector<2x8x8xf32> to vector<16x8xf32>
    %157 = arith.truncf %156 : vector<16x8xf32> to vector<16x8xbf16>
    %c0_107 = arith.constant 0 : index
    %c16 = arith.constant 16 : index
    %158 = vector.load %arg20[%c0_107, %c16] : memref<16x32xbf16, #tpu.memory_space<vmem>>, vector<16x8xbf16>
    tpu.vector_store %arg20[%c0_107, %c16], %157 {strides = array<i32>} : memref<16x32xbf16, #tpu.memory_space<vmem>>, vector<16x8xbf16>,
    %c0_108 = arith.constant 0 : index
    %c3 = arith.constant 3 : index
    %c0_109 = arith.constant 0 : index
    %c0_110 = arith.constant 0 : index
    %159 = vector.load %arg3[%c0_108, %c3, %c0_109, %c0_110] : memref<1x4x32x8xbf16, #tpu.memory_space<vmem>>, vector<1x1x32x8xbf16>
    %160 = vector.shape_cast %159 : vector<1x1x32x8xbf16> to vector<32x8xbf16>
    %cst_111 = arith.constant dense<0.000000e+00> : vector<16x8xf32>
    %161 = tpu.matmul %29, %160, %cst_111 {dimension_numbers = #tpu.dot_dimension_numbers<[1], [0], [0], [1], [0, 0, 1, 1], [], []>} : vector<16x32xbf16>, vector<32x8xbf16>, vector<16x8xf32> -> vector<16x8xf32>
    %c0_112 = arith.constant 0 : index
    %c3_113 = arith.constant 3 : index
    %c0_114 = arith.constant 0 : index
    %c0_115 = arith.constant 0 : index
    %162 = vector.load %arg4[%c0_112, %c3_113, %c0_114, %c0_115] : memref<1x4x1x8xf32, #tpu.memory_space<vmem>>, vector<1x1x1x8xf32>
    %163 = vector.shape_cast %162 : vector<1x1x1x8xf32> to vector<1x8xf32>
    %164 = vector.broadcast %163 : vector<1x8xf32> to vector<16x8xf32>
    %165 = arith.addf %161, %164 : vector<16x8xf32>
    %c0_116 = arith.constant 0 : index
    %c3_117 = arith.constant 3 : index
    %c0_118 = arith.constant 0 : index
    %c0_119 = arith.constant 0 : index
    %166 = vector.load %arg5[%c0_116, %c3_117, %c0_118, %c0_119] : memref<1x4x32x8xbf16, #tpu.memory_space<vmem>>, vector<1x1x32x8xbf16>
    %167 = vector.shape_cast %166 : vector<1x1x32x8xbf16> to vector<32x8xbf16>
    %cst_120 = arith.constant dense<0.000000e+00> : vector<16x8xf32>
    %168 = tpu.matmul %29, %167, %cst_120 {dimension_numbers = #tpu.dot_dimension_numbers<[1], [0], [0], [1], [0, 0, 1, 1], [], []>} : vector<16x32xbf16>, vector<32x8xbf16>, vector<16x8xf32> -> vector<16x8xf32>
    %c0_121 = arith.constant 0 : index
    %c3_122 = arith.constant 3 : index
    %c0_123 = arith.constant 0 : index
    %c0_124 = arith.constant 0 : index
    %169 = vector.load %arg6[%c0_121, %c3_122, %c0_123, %c0_124] : memref<1x4x1x8xf32, #tpu.memory_space<vmem>>, vector<1x1x1x8xf32>
    %170 = vector.shape_cast %169 : vector<1x1x1x8xf32> to vector<1x8xf32>
    %171 = vector.broadcast %170 : vector<1x8xf32> to vector<16x8xf32>
    %172 = arith.addf %168, %171 : vector<16x8xf32>
    %c0_125 = arith.constant 0 : index
    %c3_126 = arith.constant 3 : index
    %c0_127 = arith.constant 0 : index
    %c0_128 = arith.constant 0 : index
    %173 = vector.load %arg7[%c0_125, %c3_126, %c0_127, %c0_128] : memref<1x4x32x8xbf16, #tpu.memory_space<vmem>>, vector<1x1x32x8xbf16>
    %174 = vector.shape_cast %173 : vector<1x1x32x8xbf16> to vector<32x8xbf16>
    %cst_129 = arith.constant dense<0.000000e+00> : vector<16x8xf32>
    %175 = tpu.matmul %29, %174, %cst_129 {dimension_numbers = #tpu.dot_dimension_numbers<[1], [0], [0], [1], [0, 0, 1, 1], [], []>} : vector<16x32xbf16>, vector<32x8xbf16>, vector<16x8xf32> -> vector<16x8xf32>
    %c0_130 = arith.constant 0 : index
    %c3_131 = arith.constant 3 : index
    %c0_132 = arith.constant 0 : index
    %c0_133 = arith.constant 0 : index
    %176 = vector.load %arg8[%c0_130, %c3_131, %c0_132, %c0_133] : memref<1x4x1x8xf32, #tpu.memory_space<vmem>>, vector<1x1x1x8xf32>
    %177 = vector.shape_cast %176 : vector<1x1x1x8xf32> to vector<1x8xf32>
    %178 = vector.broadcast %177 : vector<1x8xf32> to vector<16x8xf32>
    %179 = arith.addf %175, %178 : vector<16x8xf32>
    %180 = vector.shape_cast %165 : vector<16x8xf32> to vector<2x8x8xf32>
    %181 = arith.truncf %180 : vector<2x8x8xf32> to vector<2x8x8xbf16>
    %182 = vector.shape_cast %172 : vector<16x8xf32> to vector<2x8x8xf32>
    %183 = arith.truncf %182 : vector<2x8x8xf32> to vector<2x8x8xbf16>
    %184 = vector.shape_cast %179 : vector<16x8xf32> to vector<2x8x8xf32>
    %185 = arith.truncf %184 : vector<2x8x8xf32> to vector<2x8x8xbf16>
    "tpu.trace_start"() <{level = 10 : i32, message = "bqd,bkd->bqk"}> : () -> ()
    %cst_134 = arith.constant dense<0.000000e+00> : vector<2x8x8xf32>
    %186 = tpu.matmul %181, %183, %cst_134 {dimension_numbers = #tpu.dot_dimension_numbers<[2], [2], [1], [1], [0, 0, 0, 1, 1, 1], [0], [0]>} : vector<2x8x8xbf16>, vector<2x8x8xbf16>, vector<2x8x8xf32> -> vector<2x8x8xf32>
    "tpu.trace_stop"() : () -> ()
    %cst_135 = arith.constant dense<0xFF800000> : vector<2x8xf32>
    %187 = vector.multi_reduction <maximumf>, %186, %cst_135 [2] : vector<2x8x8xf32> to vector<2x8xf32>
    %188 = vector.shape_cast %187 : vector<2x8xf32> to vector<2x8x1xf32>
    %189 = vector.broadcast %188 : vector<2x8x1xf32> to vector<2x8x8xf32>
    %190 = arith.subf %186, %189 : vector<2x8x8xf32>
    %191 = math.exp %190 : vector<2x8x8xf32>
    %cst_136 = arith.constant dense<0.000000e+00> : vector<2x8xf32>
    %192 = vector.multi_reduction <add>, %191, %cst_136 [2] : vector<2x8x8xf32> to vector<2x8xf32>
    %193 = vector.shape_cast %192 : vector<2x8xf32> to vector<2x8x1xf32>
    %194 = tpu.reciprocal %193 : vector<2x8x1xf32> -> vector<2x8x1xf32>
    %195 = vector.broadcast %194 : vector<2x8x1xf32> to vector<2x8x8xf32>
    %196 = arith.mulf %191, %195 : vector<2x8x8xf32>
    %197 = arith.truncf %196 : vector<2x8x8xf32> to vector<2x8x8xbf16>
    "tpu.trace_start"() <{level = 10 : i32, message = "bqk,bkd->bqd"}> : () -> ()
    %cst_137 = arith.constant dense<0.000000e+00> : vector<2x8x8xf32>
    %198 = tpu.matmul %197, %185, %cst_137 {dimension_numbers = #tpu.dot_dimension_numbers<[2], [1], [1], [2], [0, 0, 0, 1, 1, 2], [0], [0]>} : vector<2x8x8xbf16>, vector<2x8x8xbf16>, vector<2x8x8xf32> -> vector<2x8x8xf32>
    "tpu.trace_stop"() : () -> ()
    %199 = vector.shape_cast %198 : vector<2x8x8xf32> to vector<16x8xf32>
    %200 = arith.truncf %199 : vector<16x8xf32> to vector<16x8xbf16>
    %c0_138 = arith.constant 0 : index
    %c24 = arith.constant 24 : index
    %201 = vector.load %arg20[%c0_138, %c24] : memref<16x32xbf16, #tpu.memory_space<vmem>>, vector<16x8xbf16>
    tpu.vector_store %arg20[%c0_138, %c24], %200 {strides = array<i32>} : memref<16x32xbf16, #tpu.memory_space<vmem>>, vector<16x8xbf16>,
    %c0_139 = arith.constant 0 : index
    %c0_140 = arith.constant 0 : index
    %202 = vector.load %arg20[%c0_139, %c0_140] : memref<16x32xbf16, #tpu.memory_space<vmem>>, vector<16x32xbf16>
    %c0_141 = arith.constant 0 : index
    %c0_142 = arith.constant 0 : index
    %c0_143 = arith.constant 0 : index
    %203 = vector.load %arg9[%c0_141, %c0_142, %c0_143] : memref<1x32x32xbf16, #tpu.memory_space<vmem>>, vector<1x32x32xbf16>
    %204 = vector.shape_cast %203 : vector<1x32x32xbf16> to vector<32x32xbf16>
    %cst_144 = arith.constant dense<0.000000e+00> : vector<16x32xf32>
    %205 = tpu.matmul %202, %204, %cst_144 {dimension_numbers = #tpu.dot_dimension_numbers<[1], [0], [0], [1], [0, 0, 1, 1], [], []>} : vector<16x32xbf16>, vector<32x32xbf16>, vector<16x32xf32> -> vector<16x32xf32>
    %c0_145 = arith.constant 0 : index
    %c0_146 = arith.constant 0 : index
    %c0_147 = arith.constant 0 : index
    %206 = vector.load %arg10[%c0_145, %c0_146, %c0_147] : memref<1x1x32xf32, #tpu.memory_space<vmem>>, vector<1x1x32xf32>
    %207 = vector.shape_cast %206 : vector<1x1x32xf32> to vector<1x32xf32>
    %208 = vector.broadcast %207 : vector<1x32xf32> to vector<16x32xf32>
    %209 = arith.addf %205, %208 : vector<16x32xf32>
    %210 = arith.addf %4, %209 : vector<16x32xf32>
    %c0_148 = arith.constant 0 : index
    %c0_149 = arith.constant 0 : index
    %c0_150 = arith.constant 0 : index
    %211 = vector.load %arg13[%c0_148, %c0_149, %c0_150] : memref<1x1x32xf32, #tpu.memory_space<vmem>>, vector<1x1x32xf32>
    %212 = vector.shape_cast %211 : vector<1x1x32xf32> to vector<1x32xf32>
    %c0_151 = arith.constant 0 : index
    %c0_152 = arith.constant 0 : index
    %c0_153 = arith.constant 0 : index
    %213 = vector.load %arg14[%c0_151, %c0_152, %c0_153] : memref<1x1x32xf32, #tpu.memory_space<vmem>>, vector<1x1x32xf32>
    %214 = vector.shape_cast %213 : vector<1x1x32xf32> to vector<1x32xf32>
    %cst_154 = arith.constant dense<0.000000e+00> : vector<16xf32>
    %215 = vector.multi_reduction <add>, %210, %cst_154 [1] : vector<16x32xf32> to vector<16xf32>
    %216 = vector.shape_cast %215 : vector<16xf32> to vector<16x1xf32>
    %cst_155 = arith.constant 3.200000e+01 : f32
    %217 = vector.broadcast %cst_155 : f32 to vector<16x1xf32>
    %218 = arith.divf %216, %217 : vector<16x1xf32>
    %219 = vector.broadcast %218 : vector<16x1xf32> to vector<16x32xf32>
    %220 = arith.subf %210, %219 : vector<16x32xf32>
    %221 = arith.mulf %220, %220 : vector<16x32xf32>
    %cst_156 = arith.constant dense<0.000000e+00> : vector<16xf32>
    %222 = vector.multi_reduction <add>, %221, %cst_156 [1] : vector<16x32xf32> to vector<16xf32>
    %223 = vector.shape_cast %222 : vector<16xf32> to vector<16x1xf32>
    %cst_157 = arith.constant 3.200000e+01 : f32
    %224 = vector.broadcast %cst_157 : f32 to vector<16x1xf32>
    %225 = arith.divf %223, %224 : vector<16x1xf32>
    %cst_158 = arith.constant 9.99999974E-6 : f32
    %226 = vector.broadcast %cst_158 : f32 to vector<16x1xf32>
    %227 = arith.addf %225, %226 : vector<16x1xf32>
    %228 = math.rsqrt %227 : vector<16x1xf32>
    %229 = vector.broadcast %228 : vector<16x1xf32> to vector<16x32xf32>
    %230 = arith.mulf %220, %229 : vector<16x32xf32>
    %231 = vector.broadcast %212 : vector<1x32xf32> to vector<16x32xf32>
    %232 = arith.mulf %230, %231 : vector<16x32xf32>
    %233 = vector.broadcast %214 : vector<1x32xf32> to vector<16x32xf32>
    %234 = arith.addf %232, %233 : vector<16x32xf32>
    %235 = arith.truncf %234 : vector<16x32xf32> to vector<16x32xbf16>
    %c0_159 = arith.constant 0 : index
    %c0_160 = arith.constant 0 : index
    %c0_161 = arith.constant 0 : index
    %236 = vector.load %arg15[%c0_159, %c0_160, %c0_161] : memref<1x32x64xbf16, #tpu.memory_space<vmem>>, vector<1x32x64xbf16>
    %237 = vector.shape_cast %236 : vector<1x32x64xbf16> to vector<32x64xbf16>
    %cst_162 = arith.constant dense<0.000000e+00> : vector<16x64xf32>
    %238 = tpu.matmul %235, %237, %cst_162 {dimension_numbers = #tpu.dot_dimension_numbers<[1], [0], [0], [1], [0, 0, 1, 1], [], []>} : vector<16x32xbf16>, vector<32x64xbf16>, vector<16x64xf32> -> vector<16x64xf32>
    %c0_163 = arith.constant 0 : index
    %c0_164 = arith.constant 0 : index
    %c0_165 = arith.constant 0 : index
    %239 = vector.load %arg16[%c0_163, %c0_164, %c0_165] : memref<1x1x64xf32, #tpu.memory_space<vmem>>, vector<1x1x64xf32>
    %240 = vector.shape_cast %239 : vector<1x1x64xf32> to vector<1x64xf32>
    %241 = vector.broadcast %240 : vector<1x64xf32> to vector<16x64xf32>
    %242 = arith.addf %238, %241 : vector<16x64xf32>
    %cst_166 = arith.constant 0.000000e+00 : f32
    %243 = vector.broadcast %cst_166 : f32 to vector<16x64xf32>
    %244 = arith.maximumf %242, %243 : vector<16x64xf32>
    %245 = arith.truncf %244 : vector<16x64xf32> to vector<16x64xbf16>
    %c0_167 = arith.constant 0 : index
    %c0_168 = arith.constant 0 : index
    %c0_169 = arith.constant 0 : index
    %246 = vector.load %arg17[%c0_167, %c0_168, %c0_169] : memref<1x64x32xbf16, #tpu.memory_space<vmem>>, vector<1x64x32xbf16>
    %247 = vector.shape_cast %246 : vector<1x64x32xbf16> to vector<64x32xbf16>
    %cst_170 = arith.constant dense<0.000000e+00> : vector<16x32xf32>
    %248 = tpu.matmul %245, %247, %cst_170 {dimension_numbers = #tpu.dot_dimension_numbers<[1], [0], [0], [1], [0, 0, 1, 1], [], []>} : vector<16x64xbf16>, vector<64x32xbf16>, vector<16x32xf32> -> vector<16x32xf32>
    %c0_171 = arith.constant 0 : index
    %c0_172 = arith.constant 0 : index
    %c0_173 = arith.constant 0 : index
    %249 = vector.load %arg18[%c0_171, %c0_172, %c0_173] : memref<1x1x32xf32, #tpu.memory_space<vmem>>, vector<1x1x32xf32>
    %250 = vector.shape_cast %249 : vector<1x1x32xf32> to vector<1x32xf32>
    %251 = vector.broadcast %250 : vector<1x32xf32> to vector<16x32xf32>
    %252 = arith.addf %248, %251 : vector<16x32xf32>
    %253 = arith.addf %210, %252 : vector<16x32xf32>
    %254 = vector.shape_cast %253 : vector<16x32xf32> to vector<2x8x32xf32>
    %c0_174 = arith.constant 0 : index
    %c0_175 = arith.constant 0 : index
    %c0_176 = arith.constant 0 : index
    %255 = vector.load %arg19[%c0_174, %c0_175, %c0_176] : memref<2x8x32xf32, #tpu.memory_space<vmem>>, vector<2x8x32xf32>
    tpu.vector_store %arg19[%c0_174, %c0_175, %c0_176], %254 {strides = array<i32>} : memref<2x8x32xf32, #tpu.memory_space<vmem>>, vector<2x8x32xf32>,
    return
  }
  func.func @transform_0(%arg0: i32, %arg1: i32) -> (i32, i32, i32) {
    %c0_i32 = arith.constant 0 : i32
    %c0_i32_0 = arith.constant 0 : i32
    %c0_i32_1 = arith.constant 0 : i32
    return %arg0, %c0_i32, %c0_i32_0 : i32, i32, i32
  }
  func.func @transform_1(%arg0: i32, %arg1: i32) -> (i32, i32, i32, i32) {
    %c0_i32 = arith.constant 0 : i32
    %c0_i32_0 = arith.constant 0 : i32
    %c0_i32_1 = arith.constant 0 : i32
    %c0_i32_2 = arith.constant 0 : i32
    return %arg1, %c0_i32, %c0_i32_0, %c0_i32_1 : i32, i32, i32, i32
  }
  func.func @transform_2(%arg0: i32, %arg1: i32) -> (i32, i32, i32, i32) {
    %c0_i32 = arith.constant 0 : i32
    %c0_i32_0 = arith.constant 0 : i32
    %c0_i32_1 = arith.constant 0 : i32
    %c0_i32_2 = arith.constant 0 : i32
    return %arg1, %c0_i32, %c0_i32_0, %c0_i32_1 : i32, i32, i32, i32
  }
  func.func @transform_3(%arg0: i32, %arg1: i32) -> (i32, i32, i32, i32) {
    %c0_i32 = arith.constant 0 : i32
    %c0_i32_0 = arith.constant 0 : i32
    %c0_i32_1 = arith.constant 0 : i32
    %c0_i32_2 = arith.constant 0 : i32
    return %arg1, %c0_i32, %c0_i32_0, %c0_i32_1 : i32, i32, i32, i32
  }
  func.func @transform_4(%arg0: i32, %arg1: i32) -> (i32, i32, i32, i32) {
    %c0_i32 = arith.constant 0 : i32
    %c0_i32_0 = arith.constant 0 : i32
    %c0_i32_1 = arith.constant 0 : i32
    %c0_i32_2 = arith.constant 0 : i32
    return %arg1, %c0_i32, %c0_i32_0, %c0_i32_1 : i32, i32, i32, i32
  }
  func.func @transform_5(%arg0: i32, %arg1: i32) -> (i32, i32, i32, i32) {
    %c0_i32 = arith.constant 0 : i32
    %c0_i32_0 = arith.constant 0 : i32
    %c0_i32_1 = arith.constant 0 : i32
    %c0_i32_2 = arith.constant 0 : i32
    return %arg1, %c0_i32, %c0_i32_0, %c0_i32_1 : i32, i32, i32, i32
  }
  func.func @transform_6(%arg0: i32, %arg1: i32) -> (i32, i32, i32, i32) {
    %c0_i32 = arith.constant 0 : i32
    %c0_i32_0 = arith.constant 0 : i32
    %c0_i32_1 = arith.constant 0 : i32
    %c0_i32_2 = arith.constant 0 : i32
    return %arg1, %c0_i32, %c0_i32_0, %c0_i32_1 : i32, i32, i32, i32
  }
  func.func @transform_7(%arg0: i32, %arg1: i32) -> (i32, i32, i32) {
    %c0_i32 = arith.constant 0 : i32
    %c0_i32_0 = arith.constant 0 : i32
    %c0_i32_1 = arith.constant 0 : i32
    return %arg1, %c0_i32, %c0_i32_0 : i32, i32, i32
  }
  func.func @transform_8(%arg0: i32, %arg1: i32) -> (i32, i32, i32) {
    %c0_i32 = arith.constant 0 : i32
    %c0_i32_0 = arith.constant 0 : i32
    %c0_i32_1 = arith.constant 0 : i32
    return %arg1, %c0_i32, %c0_i32_0 : i32, i32, i32
  }
  func.func @transform_9(%arg0: i32, %arg1: i32) -> (i32, i32, i32) {
    %c0_i32 = arith.constant 0 : i32
    %c0_i32_0 = arith.constant 0 : i32
    %c0_i32_1 = arith.constant 0 : i32
    return %arg1, %c0_i32, %c0_i32_0 : i32, i32, i32
  }
  func.func @transform_10(%arg0: i32, %arg1: i32) -> (i32, i32, i32) {
    %c0_i32 = arith.constant 0 : i32
    %c0_i32_0 = arith.constant 0 : i32
    %c0_i32_1 = arith.constant 0 : i32
    return %arg1, %c0_i32, %c0_i32_0 : i32, i32, i32
  }
  func.func @transform_11(%arg0: i32, %arg1: i32) -> (i32, i32, i32) {
    %c0_i32 = arith.constant 0 : i32
    %c0_i32_0 = arith.constant 0 : i32
    %c0_i32_1 = arith.constant 0 : i32
    return %arg1, %c0_i32, %c0_i32_0 : i32, i32, i32
  }
  func.func @transform_12(%arg0: i32, %arg1: i32) -> (i32, i32, i32) {
    %c0_i32 = arith.constant 0 : i32
    %c0_i32_0 = arith.constant 0 : i32
    %c0_i32_1 = arith.constant 0 : i32
    return %arg1, %c0_i32, %c0_i32_0 : i32, i32, i32
  }
  func.func @transform_13(%arg0: i32, %arg1: i32) -> (i32, i32, i32) {
    %c0_i32 = arith.constant 0 : i32
    %c0_i32_0 = arith.constant 0 : i32
    %c0_i32_1 = arith.constant 0 : i32
    return %arg1, %c0_i32, %c0_i32_0 : i32, i32, i32
  }
  func.func @transform_14(%arg0: i32, %arg1: i32) -> (i32, i32, i32) {
    %c0_i32 = arith.constant 0 : i32
    %c0_i32_0 = arith.constant 0 : i32
    %c0_i32_1 = arith.constant 0 : i32
    return %arg1, %c0_i32, %c0_i32_0 : i32, i32, i32
  }
  func.func @transform_15(%arg0: i32, %arg1: i32) -> (i32, i32, i32) {
    %c0_i32 = arith.constant 0 : i32
    %c0_i32_0 = arith.constant 0 : i32
    %c0_i32_1 = arith.constant 0 : i32
    return %arg1, %c0_i32, %c0_i32_0 : i32, i32, i32
  }
  func.func @transform_16(%arg0: i32, %arg1: i32) -> (i32, i32, i32) {
    %c0_i32 = arith.constant 0 : i32
    %c0_i32_0 = arith.constant 0 : i32
    %c0_i32_1 = arith.constant 0 : i32
    return %arg1, %c0_i32, %c0_i32_0 : i32, i32, i32
  }
  func.func @transform_17(%arg0: i32, %arg1: i32) -> (i32, i32, i32) {
    %c0_i32 = arith.constant 0 : i32
    %c0_i32_0 = arith.constant 0 : i32
    %c0_i32_1 = arith.constant 0 : i32
    return %arg0, %c0_i32, %c0_i32_0 : i32, i32, i32
  }
}

</mosaic_0001>

<bundles_post_ra>
// kernel: tpu_custom_call.1
= control target key start
LH: loop header
LB: loop body
LE: loop exit
PB: predicated region body
PF: predicated region fallthrough
CT: control target
= control target key end

     0   :  { %s4275_s0 = inlined_call_operand.vmem [shape: f32[2,8,32], index: 0, kind: input, shape index: {}]   ;;  %s4276_s1 = inlined_call_operand.vmem [shape: bf16[2,4,32,8], index: 1, kind: input, shape index: {}]   ;;  %s4277_s2 = inlined_call_operand.vmem [shape: f32[2,4,1,8], index: 2, kind: input, shape index: {}]   ;;  %s4278_s3 = inlined_call_operand.vmem [shape: bf16[2,4,32,8], index: 3, kind: input, shape index: {}]   ;;  %s4279_s4 = inlined_call_operand.vmem [shape: f32[2,4,1,8], index: 4, kind: input, shape index: {}]   ;;  %s4280_s5 = inlined_call_operand.vmem [shape: bf16[2,4,32,8], index: 5, kind: input, shape index: {}]   ;;  %s4281_s6 = inlined_call_operand.vmem [shape: f32[2,4,1,8], index: 6, kind: input, shape index: {}]   ;;  %s4282_s7 = inlined_call_operand.vmem [shape: bf16[2,32,32], index: 7, kind: input, shape index: {}]   ;;  %s4283_s8 = inlined_call_operand.vmem [shape: f32[2,1,32], index: 8, kind: input, shape index: {}]   ;;  %s4284_s9 = inlined_call_operand.vmem [shape: f32[2,1,32], index: 9, kind: input, shape index: {}]   ;;  %s4285_s10 = inlined_call_operand.vmem [shape: f32[2,1,32], index: 10, kind: input, shape index: {}]   ;;  %s4286_s11 = inlined_call_operand.vmem [shape: f32[2,1,32], index: 11, kind: input, shape index: {}]   ;;  %s4287_s12 = inlined_call_operand.vmem [shape: f32[2,1,32], index: 12, kind: input, shape index: {}]   ;;  %s4288_s13 = inlined_call_operand.vmem [shape: bf16[2,32,64], index: 13, kind: input, shape index: {}]   ;;  %s4289_s14 = inlined_call_operand.vmem [shape: f32[2,1,64], index: 14, kind: input, shape index: {}]   ;;  %s4290_s15 = inlined_call_operand.vmem [shape: bf16[2,64,32], index: 15, kind: input, shape index: {}]   ;;  %s4291_s16 = inlined_call_operand.vmem [shape: f32[2,1,32], index: 16, kind: input, shape index: {}]   ;;  %s4292_s17 = inlined_call_operand.hbm [shape: f32[2,8,32], index: 17, kind: output, shape index: {}]  }
   0x1   :  { %4300 = sst [smem:[#allocation13_spill]] %s4275_s0 }
   0x2   :  { %4301 = sst [smem:[#allocation14_spill]] %s4276_s1 }
   0x3   :  { %4302 = sst [smem:[#allocation15_spill]] %s4277_s2 }
   0x4   :  { %4303 = sst [smem:[#allocation16_spill]] %s4278_s3 }
   0x5   :  { %4304 = sst [smem:[#allocation17_spill]] %s4279_s4 }
   0x6   :  { %4305 = sst [smem:[#allocation18_spill]] %s4280_s5 }
   0x7   :  { %4306 = sst [smem:[#allocation19_spill]] %s4281_s6 }
   0x8   :  { %4307 = sst [smem:[#allocation20_spill]] %s4282_s7 }
   0x9   :  { %4308 = sst [smem:[#allocation21_spill]] %s4292_s17 }
   0xa   :  { %22 = vsyncpa [#allocation4], 0  ;;  %s3836_s24 = smov 0   ;;  %s3838_s25 = smov 0  }
   0xb   :  { %s3840_s26 = smov 0  }
   0xc LB: > { %4309 = sst [smem:[#allocation6_spill]] %s3729_s24  ;;  %s37_s28 = sadd.s32 1, %s3733_s25  ;;  %s3737_s26 = sphi %s3840_s26, %s28_s26   ;;  %s3733_s25 = sphi %s3838_s25, %s4339_s25   ;;  %s3729_s24 = sphi %s3836_s24, %s4338_s24  }
   0xd   : > { %4310 = sst [smem:[#allocation7_spill]] %s3733_s25  ;;  %p38_p0 = scmp.ge.s32.totalorder %s37_s28, 2 }
   0xe   : > { %4311 = sst [smem:[#allocation8_spill]] %s3737_s26  ;;  %p3105_p1 = scmp.ge.s32.totalorder %s3737_s26, 1 }
   0xf   : > { %p644_p2 = scmp.lt.s32.totalorder %s3737_s26, 3  ;;  %s4341_s28 = smov (%p38_p0, %s37_s28), 0 }
  0x10   : > { %4312 = sst [smem:[#allocation9_spill]] %s4341_s28 }
  0x11   : > { %p645_p3 = pnand %p3105_p1, %p644_p2 }
  0x13   : > { %648 = sbr.rel (%p645_p3) target bundleno = 4513 (0x11a1), region = 88 }
  0x18   : > { %p760_p4 = scmp.lt.s32.totalorder %s3729_s24, 1  ;;  %s4313_s1 = sld [smem:[#allocation14_spill]] }
  0x19   : > { %s4315_s2 = sld [smem:[#allocation15_spill]] }
  0x1a   : > { %s3859_s29 = scalar_select %p760_p4, %s3729_s24, 1 }
  0x1b   : > { %s4317_s3 = sld [smem:[#allocation16_spill]] }
  0x1c   : > { %s3262_s0 = sshll.u32 %s3859_s29, 6  ;;  %s3108_s30 = sshll.u32 %s3859_s29, 2 }
  0x1d   : > { %s4319_s4 = sld [smem:[#allocation17_spill]]  ;;  %s814_s26 = scalar_lea.vmem %s4289_s14, %s3859_s29 }
  0x1e   : > { %s3866_s20 = scalar_lea.vmem %s4313_s1, %s3262_s0  ;;  %s4320_s5 = sld [smem:[#allocation18_spill]] }
  0x1f   : > { %4314 = sst [smem:[#allocation10_spill]] %s3866_s20  ;;  %s3871_s23 = scalar_lea.vmem %s4315_s2, %s3108_s30 }
  0x20   : > { %4316 = sst [smem:[#allocation11_spill]] %s3871_s23  ;;  %s3265_s2 = sshll.u32 %s3859_s29, 4 }
  0x21   : > { %s3876_s25 = scalar_lea.vmem %s4317_s3, %s3262_s0  ;;  %s4321_s6 = sld [smem:[#allocation19_spill]] }
  0x22   : > { %4318 = sst [smem:[#allocation12_spill]] %s3876_s25  ;;  %s3922_s23 = scalar_lea.vmem %s4288_s13, %s3265_s2 }
  0x23   : > { %s3881_s24 = scalar_lea.vmem %s4319_s4, %s3108_s30  ;;  %s4322_s7 = sld [smem:[#allocation20_spill]] }
  0x24   : > { %s3886_s1 = scalar_lea.vmem %s4320_s5, %s3262_s0  ;;  %s803_s5 = scalar_lea.vmem %s4286_s11, %s3859_s29 }
  0x25   : > { %s3267_s0 = sshll.u32 %s3859_s29, 5  ;;  %s4323_s27 = sld [smem:[#allocation6_spill]] }
  0x26   : > { %s3932_s20 = scalar_lea.vmem %s4290_s15, %s3267_s0 }
  0x27   : > { %s3891_s22 = scalar_lea.vmem %s4321_s6, %s3108_s30  ;;  %s822_s6 = scalar_lea.vmem %s4291_s16, %s3859_s29 }
  0x29   : > { %s3901_s17 = scalar_lea.vmem %s4322_s7, %s3265_s2 }
  0x2b   : > { %p3121_p5 = scmp.ne.s32.totalorder %s4323_s27, 0 }
  0x2c   : > { %s4324_s25 = sld [smem:[#allocation13_spill]] (!%p3121_p5) }
  0x2d   : > { %828 = sbr.rel (%p3121_p5) target bundleno = 53 (0x35), region = 92 }
  0x32   : > { %s4325_s28 = smov %s4324_s25  ;;  %v829_v0 = vld [vmem:[%s4324_s25] sm:$0xff]  ;;  %vm831_vm0 = vcmask 261120  }
  0x33   : > { %v830_v1 = vld [vmem:[%s4325_s28 + $0x8] sm:$0xff]  ;;  %832 = vst.msk [vmem:[#allocation3] sm:$0xff] %vm831_vm0, %v829_v0 }
  0x34   : > { %833 = vst.msk [vmem:[#allocation3 + $0x8] sm:$0xff] %vm831_vm0, %v830_v1 }
  0x35 PF: > { %vm838_vm1 = vcmask 261120   ;;  %s4326_s0 = sld [smem:[#allocation10_spill]]  ;;  %v3613_v17 = vld [vmem:[%s3886_s1 + $0x8] sm:$0xff]   ;;  %v3739_v18 = vmov 0.0   ;;  %v3615_v20 = vld [vmem:[%s3886_s1] sm:$0xff]   ;;  %vm3740_vm2 = vmmov 0   ;;  %s4328_s21 = scalar_lea.vmem %s4284_s9, %s3859_s29 }
  0x36   : > { %3355 = vmatprep.subr.bf16.mxu1 %v3739_v18  ;;  %3371 = vmatprep.subr.bf16.mxu0 %v3739_v18  ;;  %s4327_s18 = sld [smem:[#allocation12_spill]]  ;;  %v3122_v29 = vld [vmem:[%s4328_s21] ss:$0 sm:$0xff]  ;;  %s4329_s2 = scalar_lea.vmem %s4285_s10, %s3859_s29  ;;  %vm1084_vm3 = vcmask 64512   ;;  %vm1204_vm4 = vcmask 1043456   ;;  %vm1302_vm5 = vcmask 60416  }
  0x37   : > { %3372 = vmatpush3.bf16.msra.mxu0 %v3613_v17  ;;  %3359 = vmatprep.mubr.msk.bf16.mxu1 %vm3740_vm2, %v3739_v18  ;;  %v3123_v33 = vld [vmem:[%s4329_s2] ss:$0 sm:$0xff]  ;;  %s4330_s25 = sld [smem:[#allocation11_spill]]  ;;  %vm1729_vm6 = vcmask 126016   ;;  %vm2156_vm7 = vcmask 191616   ;;  %vm2583_vm8 = vcmask 257216   ;;  %s4331_s4 = scalar_lea.vmem %s4283_s8, %s3859_s29 }
  0x38   : > { %3373 = vmatprep.subr.bf16.mxu0 %v3739_v18  ;;  %3375 = vmatprep.mubr.msk.bf16.mxu0 %vm3740_vm2, %v3739_v18  ;;  %v3128_v48 = vld [vmem:[%s3881_s24] ss:$0 sm:$0xff]  ;;  %s4332_s30 = scalar_lea.vmem %s4287_s12, %s3859_s29  ;;  %s4333_s27 = sld [smem:[#allocation8_spill]]  ;;  %vm2816_vm9 = vcmask 523264  }
  0x39   : > { %v3132_v51 = vld [vmem:[%s3891_s22] ss:$0 sm:$0xff] }
  0x3a   : > { %v834_v2 = vld [vmem:[#allocation3] sm:$0xff] }
  0x3b   : > { %v835_v3 = vld [vmem:[#allocation3 + $0x8] sm:$0xff]  ;;  %v839_v4 = vsel %vm838_vm1, %v834_v2, 0.0  ;;  %v3612_v16 = vld [vmem:[%s4326_s0 + $0x8] sm:$0xff]   ;;  %v3614_v19 = vld [vmem:[%s4326_s0] sm:$0xff]   ;;  %3374 = vmatpush3.bf16.msra.mxu0 %v3615_v20 }
  0x3c   : > { %v842_v5 = vsel %vm838_vm1, %v835_v3, 0.0  ;;  %840 = vadd.xlane.f32.xlu0 %v839_v4  ;;  %3356 = vmatpush3.bf16.msra.mxu1 %v3612_v16  ;;  %v3616_v37 = vld [vmem:[%s4327_s18 + $0x8] sm:$0xff]   ;;  %v3617_v39 = vld [vmem:[%s4327_s18] sm:$0xff]  }
  0x3d   : > { %3357 = vmatprep.subr.bf16.mxu1 %v3739_v18  ;;  %3385 = vmatprep.subr.bf16.mxu0 %v3739_v18  ;;  %v3124_v54 = vld [vmem:[%s4330_s25] ss:$0 sm:$0xff] }
  0x40   : > { %843 = vadd.xlane.f32.xlu0 %v842_v5  ;;  %3358 = vmatpush3.bf16.msra.mxu1 %v3614_v19 }
  0x41   : > { %3363 = vmatprep.subr.bf16.mxu1 %v3739_v18 }
  0xc5   : > { %v841_v6 = vpop.xlane.xlu0 %840 }
  0xc6   : > { %v846_v7 = vmul.f32 0.03125, %v841_v6 }
  0xc8   : > { %v848_v8 = vsub.f32 %v834_v2, %v846_v7 }
  0xc9   : > { %v844_v9 = vpop.xlane.xlu0 %843 }
  0xca   : > { %v847_v10 = vmul.f32 0.03125, %v844_v9  ;;  %v850_v11 = vmul.f32 %v848_v8, %v848_v8 }
  0xcc   : > { %v849_v12 = vsub.f32 %v835_v3, %v847_v10  ;;  %v852_v13 = vsel %vm838_vm1, %v850_v11, 0.0 }
  0xcd   : > { %853 = vadd.xlane.f32.xlu1 %v852_v13 }
  0xce   : > { %v851_v14 = vmul.f32 %v849_v12, %v849_v12 }
  0xd0   : > { %v855_v15 = vsel %vm838_vm1, %v851_v14, 0.0 }
  0xd1   : > { %856 = vadd.xlane.f32.xlu1 %v855_v15 }
 0x156   : > { %v854_v21 = vpop.xlane.xlu1 %853 }
 0x157   : > { %v858_v22 = vmul.f32 0.03125, %v854_v21 }
 0x159   : > { %v860_v23 = vadd.f32 1e-05, %v858_v22 }
 0x15a   : > { %v857_v24 = vpop.xlane.xlu1 %856 }
 0x15b   : > { %3645 = vrsqrt.f32 %v860_v23  ;;  %v859_v25 = vmul.f32 0.03125, %v857_v24 }
 0x15d   : > { %v861_v26 = vadd.f32 1e-05, %v859_v25 }
 0x15f   : > { %3647 = vrsqrt.f32 %v861_v26 }
 0x168   : > { %v3646_v27 = vpop.eup %3645 }
 0x169   : > { %v864_v28 = vmul.f32 %v3646_v27, %v848_v8 }
 0x16b   : > { %v872_v31 = vmul.f32 %v3122_v29, %v864_v28 }
 0x16c   : > { %v3648_v30 = vpop.eup %3647 }
 0x16d   : > { %v865_v32 = vmul.f32 %v3648_v30, %v849_v12  ;;  %v880_v35 = vadd.f32 %v3123_v33, %v872_v31 }
 0x16f   : > { %v873_v34 = vmul.f32 %v3122_v29, %v865_v32  ;;  %v3618_v32 = vld [vmem:[%s4326_s0 + $0x18] sm:$0xff]  }
 0x171   : > { %v881_v36 = vadd.f32 %v3123_v33, %v873_v34 }
 0x173   : > { %v3974_v38 = vpack.c.bf16 %v881_v36, %v880_v35  ;;  %v3619_v36 = vld [vmem:[%s4326_s0 + $0x10] sm:$0xff]  }
 0x175   : > { %3360 = vmatmul.mubr.msk.bf16.vlgmr.msra.gmra.mxu1 %vm838_vm1, %v3974_v38  ;;  %3376 = vmatmul.mubr.msk.bf16.vlgmr.msra.gmra.mxu0 %vm838_vm1, %v3974_v38 }
 0x176   : > { %3364 = vmatpush3.bf16.msra.mxu1 %v3616_v37  ;;  %3367 = vmatprep.mubr.msk.bf16.mxu1 %vm3740_vm2, %v3739_v18  ;;  %v3620_v37 = vld [vmem:[%s4327_s18 + $0x18] sm:$0xff]  }
 0x177   : > { %3365 = vmatprep.subr.bf16.mxu1 %v3739_v18  ;;  %3387 = vmatprep.mubr.msk.bf16.mxu0 %vm3740_vm2, %v3739_v18 }
 0x17a   : > { %3366 = vmatpush3.bf16.msra.mxu1 %v3617_v39 }
 0x17b   : > { %3379 = vmatprep.subr.bf16.mxu1 %v3739_v18 }
 0x17d   : > { %3368 = vmatmul.mubr.msk.bf16.vlgmr.msra.gmra.mxu1 %vm838_vm1, %v3974_v38 }
 0x17e   : > { %3381 = vmatprep.mubr.msk.bf16.mxu1 %vm3740_vm2, %v3739_v18 }
 0x235   : > { %v943_v40 = vpop.f32.mrf.mxu1  ;;  %v1071_v41 = vpop.f32.mrf.mxu0 }
 0x236   : > { %v1072_v56 = vadd.f32 %v3132_v51, %v1071_v41  ;;  %v944_v60 = vadd.f32 %v3124_v54, %v943_v40  ;;  %v3621_v40 = vld [vmem:[%s4327_s18 + $0x10] sm:$0xff]   ;;  %v3622_v41 = vld [vmem:[%s3886_s1 + $0x18] sm:$0xff]  }
 0x237   : > { %v3361_v42 = vpop.f32.mrf.mxu1  ;;  %v3377_v43 = vpop.f32.mrf.mxu0 }
 0x238   : > { %v1082_v62 = vpack.c.bf16 %v1072_v56, %v1072_v56  ;;  %v1078_v1 = vpack.c.bf16 %v944_v60, %v944_v60  ;;  %v3623_v42 = vld [vmem:[%s3886_s1 + $0x10] sm:$0xff]  }
 0x239   : > { %v946_v44 = vpop.f32.mrf.mxu1  ;;  %v1074_v45 = vpop.f32.mrf.mxu0 }
 0x23a   : > { %v1075_v63 = vadd.f32 %v3132_v51, %v1074_v45  ;;  %v947_v2 = vadd.f32 %v3124_v54, %v946_v44  ;;  %v1206_v3 = vsel %vm1204_vm4, %v1082_v62, 0 }
 0x23b   : > { %v3362_v46 = vpop.f32.mrf.mxu1  ;;  %v3378_v47 = vpop.f32.mrf.mxu0 }
 0x23c   : > { %v1083_v4 = vpack.c.bf16 %v1075_v63, %v1075_v63  ;;  %v1079_v5 = vpack.c.bf16 %v947_v2, %v947_v2  ;;  %v3147_v63 = vld [vmem:[%s4330_s25 + $0x1] ss:$0 sm:$0xff] }
 0x23d   : > { %v1007_v49 = vpop.f32.mrf.mxu1 }
 0x23e   : > { %v1008_v50 = vadd.f32 %v3128_v48, %v1007_v49  ;;  %v1252_v6 = vsel %vm1204_vm4, %v1083_v4, 0 }
 0x23f   : > { %v3369_v52 = vpop.f32.mrf.mxu1 }
 0x240   : > { %v1080_v53 = vpack.c.bf16 %v1008_v50, %v1008_v50 }
 0x241   : > { %v1010_v55 = vpop.f32.mrf.mxu1 }
 0x242   : > { %v1089_v57 = vsel %vm1084_vm3, %v1080_v53, 0  ;;  %v1011_v58 = vadd.f32 %v3128_v48, %v1010_v55  ;;  %v3156_v55 = vld [vmem:[%s3881_s24 + $0x1] ss:$0 sm:$0xff] }
 0x243   : > { %v3370_v59 = vpop.f32.mrf.mxu1  ;;  %3380 = vmatpush3.bf16.xpose.msra.mxu1 %v1089_v57 }
 0x244   : > { %v1081_v61 = vpack.c.bf16 %v1011_v58, %v1011_v58  ;;  %3391 = vmatprep.subr.bf16.mxu1 %v3739_v18 }
 0x246   : > { %v1135_v0 = vsel %vm1084_vm3, %v1081_v61, 0  ;;  %v3165_v61 = vld [vmem:[%s3891_s22 + $0x1] ss:$0 sm:$0xff] }
 0x247   : > { %3386 = vmatpush3.bf16.xpose.msra.mxu0 %v1135_v0 }
 0x248   : > { %3397 = vmatprep.subr.bf16.mxu0 %v3739_v18 }
 0x24a   : > { %3382 = vmatmul.mubr.msk.bf16.vlgmr.msra.gmra.mxu1 %vm1084_vm3, %v1078_v1 }
 0x24b   : > { %3392 = vmatpush3.bf16.msra.mxu1 %v1206_v3  ;;  %3393 = vmatprep.mubr.msk.bf16.mxu1 %vm3740_vm2, %v3739_v18 }
 0x24c   : > { %3403 = vmatprep.subr.bf16.mxu1 %v3739_v18 }
 0x24e   : > { %3388 = vmatmul.mubr.msk.bf16.vlgmr.msra.gmra.mxu0 %vm1084_vm3, %v1079_v5 }
 0x24f   : > { %3398 = vmatpush3.bf16.msra.mxu0 %v1252_v6  ;;  %3399 = vmatprep.mubr.msk.bf16.mxu0 %vm3740_vm2, %v3739_v18 }
 0x250   : > { %3411 = vmatprep.subr.bf16.mxu0 %v3739_v18 }
 0x30a   : > { %v1125_v7 = vpop.f32.mrf.mxu1 }
 0x30b   : > { %v1177_v8 = vsel %vm1084_vm3, %v1125_v7, -inf }
 0x30c   : > { %1178 = vmax.xlane.f32.xlu1 %v1177_v8  ;;  %v3383_v9 = vpop.f32.mrf.mxu1 }
 0x30e   : > { %v1128_v10 = vpop.f32.mrf.mxu1  ;;  %v1171_v11 = vpop.f32.mrf.mxu0 }
 0x30f   : > { %v1180_v12 = vsel %vm1084_vm3, %v1171_v11, -inf }
 0x310   : > { %1181 = vmax.xlane.f32.xlu0 %v1180_v12  ;;  %v3384_v13 = vpop.f32.mrf.mxu1  ;;  %v3389_v14 = vpop.f32.mrf.mxu0 }
 0x312   : > { %v1174_v15 = vpop.f32.mrf.mxu0 }
 0x314   : > { %v3390_v16 = vpop.f32.mrf.mxu0 }
 0x395   : > { %v1179_v17 = vpop.xlane.xlu1 %1178 }
 0x396   : > { %v1183_v19 = vsub.f32 %v1125_v7, %v1179_v17 }
 0x398   : > { %v1185_v20 = vmul.f32 1.442695, %v1183_v19 }
 0x399   : > { %v1182_v21 = vpop.xlane.xlu0 %1181 }
 0x39a   : > { %3649 = vpow2.f32 %v1185_v20  ;;  %v1184_v22 = vsub.f32 %v1171_v11, %v1182_v21 }
 0x39c   : > { %v1187_v23 = vmul.f32 1.442695, %v1184_v22 }
 0x39e   : > { %3651 = vpow2.f32 %v1187_v23 }
 0x3a7   : > { %v3650_v24 = vpop.eup %3649 }
 0x3a8   : > { %v1189_v25 = vsel %vm1084_vm3, %v3650_v24, 0.0 }
 0x3a9   : > { %1190 = vadd.xlane.f32.xlu1 %v1189_v25 }
 0x3ab   : > { %v3652_v26 = vpop.eup %3651 }
 0x3ac   : > { %v1192_v27 = vsel %vm1084_vm3, %v3652_v26, 0.0 }
 0x3ad   : > { %1193 = vadd.xlane.f32.xlu0 %v1192_v27 }
 0x432   : > { %v1191_v28 = vpop.xlane.xlu1 %1190 }
 0x433   : > { %3653 = vrcp.f32 %v1191_v28 }
 0x436   : > { %v1194_v29 = vpop.xlane.xlu0 %1193 }
 0x437   : > { %3655 = vrcp.f32 %v1194_v29 }
 0x440   : > { %v3654_v30 = vpop.eup %3653 }
 0x441   : > { %v1197_v31 = vmul.f32 %v3654_v30, %v3650_v24 }
 0x443   : > { %v1199_v33 = vpack.c.bf16 %v1197_v31, %v1197_v31 }
 0x444   : > { %v3656_v34 = vpop.eup %3655 }
 0x445   : > { %3394 = vmatmul.mubr.msk.bf16.vlgmr.msra.gmra.mxu1 %vm1084_vm3, %v1199_v33  ;;  %v1198_v35 = vmul.f32 %v3656_v34, %v3652_v26 }
 0x446   : > { %3404 = vmatpush3.bf16.msra.mxu1 %v3618_v32  ;;  %3407 = vmatprep.mubr.msk.bf16.mxu1 %vm3740_vm2, %v3739_v18 }
 0x447   : > { %v1200_v39 = vpack.c.bf16 %v1198_v35, %v1198_v35  ;;  %3405 = vmatprep.subr.bf16.mxu1 %v3739_v18 }
 0x449   : > { %3400 = vmatmul.mubr.msk.bf16.vlgmr.msra.gmra.mxu0 %vm1084_vm3, %v1200_v39 }
 0x44a   : > { %3406 = vmatpush3.bf16.msra.mxu1 %v3619_v36  ;;  %3412 = vmatpush3.bf16.msra.mxu0 %v3620_v37 }
 0x44b   : > { %3413 = vmatprep.subr.bf16.mxu0 %v3739_v18  ;;  %3419 = vmatprep.subr.bf16.mxu1 %v3739_v18 }
 0x44c   : > { %3415 = vmatprep.mubr.msk.bf16.mxu0 %vm3740_vm2, %v3739_v18 }
 0x44d   : > { %3408 = vmatmul.mubr.msk.bf16.vlgmr.msra.gmra.mxu1 %vm838_vm1, %v3974_v38 }
 0x44e   : > { %3414 = vmatpush3.bf16.msra.mxu0 %v3621_v40  ;;  %3420 = vmatpush3.bf16.msra.mxu1 %v3622_v41 }
 0x44f   : > { %3421 = vmatprep.subr.bf16.mxu1 %v3739_v18  ;;  %3423 = vmatprep.mubr.msk.bf16.mxu1 %vm3740_vm2, %v3739_v18 }
 0x450   : > { %3427 = vmatprep.subr.bf16.mxu0 %v3739_v18 }
 0x451   : > { %3416 = vmatmul.mubr.msk.bf16.vlgmr.msra.gmra.mxu0 %vm838_vm1, %v3974_v38 }
 0x452   : > { %3422 = vmatpush3.bf16.msra.mxu1 %v3623_v42  ;;  %3429 = vmatprep.mubr.msk.bf16.mxu0 %vm3740_vm2, %v3739_v18 }
 0x453   : > { %3433 = vmatprep.subr.bf16.mxu1 %v3739_v18 }
 0x455   : > { %3424 = vmatmul.mubr.msk.bf16.vlgmr.msra.gmra.mxu1 %vm838_vm1, %v3974_v38 }
 0x456   : > { %3435 = vmatprep.mubr.msk.bf16.mxu1 %vm3740_vm2, %v3739_v18 }
 0x505   : > { %v1242_v43 = vpop.f32.mrf.mxu1 }
 0x506   : > { %v3268_v44 = vpack.c.bf16 %v1242_v43, %v1242_v43 }
 0x507   : > { %v3395_v45 = vpop.f32.mrf.mxu1 }
 0x508   : > { %1303 = vst.msk [vmem:[#allocation2] sm:$0xf] %vm1302_vm5, %v3268_v44 }
 0x509   : > { %v1245_v46 = vpop.f32.mrf.mxu1  ;;  %v1288_v47 = vpop.f32.mrf.mxu0 }
 0x50a   : > { %v3269_v48 = vpack.c.bf16 %v1288_v47, %v1288_v47  ;;  %v3624_v46 = vld [vmem:[%s4326_s0 + $0x28] sm:$0xff]  }
 0x50b   : > { %v3396_v49 = vpop.f32.mrf.mxu1  ;;  %v3401_v50 = vpop.f32.mrf.mxu0 }
 0x50c   : > { %1304 = vst.msk [vmem:[#allocation2 + $0x4] sm:$0xf] %vm1302_vm5, %v3269_v48  ;;  %v3625_v50 = vld [vmem:[%s4326_s0 + $0x20] sm:$0xff]  }
 0x50d   : > { %v1291_v51 = vpop.f32.mrf.mxu0  ;;  %v1364_v52 = vpop.f32.mrf.mxu1 }
 0x50e   : > { %v1365_v7 = vadd.f32 %v3147_v63, %v1364_v52  ;;  %v3626_v51 = vld [vmem:[%s4327_s18 + $0x28] sm:$0xff]  }
 0x50f   : > { %v3402_v53 = vpop.f32.mrf.mxu0  ;;  %v3409_v54 = vpop.f32.mrf.mxu1 }
 0x510   : > { %v1503_v14 = vpack.c.bf16 %v1365_v7, %v1365_v7  ;;  %v3627_v53 = vld [vmem:[%s4327_s18 + $0x20] sm:$0xff]   ;;  %v3628_v54 = vld [vmem:[%s3886_s1 + $0x28] sm:$0xff]  }
 0x511   : > { %v1367_v56 = vpop.f32.mrf.mxu1  ;;  %v1430_v57 = vpop.f32.mrf.mxu0 }
 0x512   : > { %v1431_v58 = vadd.f32 %v3156_v55, %v1430_v57  ;;  %v1368_v15 = vadd.f32 %v3147_v63, %v1367_v56 }
 0x513   : > { %v3410_v59 = vpop.f32.mrf.mxu1  ;;  %v3417_v60 = vpop.f32.mrf.mxu0 }
 0x514   : > { %v1505_v62 = vpack.c.bf16 %v1431_v58, %v1431_v58  ;;  %v1504_v19 = vpack.c.bf16 %v1368_v15, %v1368_v15 }
 0x515   : > { %v1433_v0 = vpop.f32.mrf.mxu0  ;;  %v1496_v1 = vpop.f32.mrf.mxu1 }
 0x516   : > { %v1513_v2 = vsel %vm1084_vm3, %v1505_v62, 0  ;;  %v1434_v3 = vadd.f32 %v3156_v55, %v1433_v0  ;;  %v1497_v4 = vadd.f32 %v3165_v61, %v1496_v1  ;;  %v3629_v55 = vld [vmem:[%s3886_s1 + $0x20] sm:$0xff]  }
 0x517   : > { %v3418_v5 = vpop.f32.mrf.mxu0  ;;  %v3425_v6 = vpop.f32.mrf.mxu1  ;;  %3428 = vmatpush3.bf16.xpose.msra.mxu0 %v1513_v2  ;;  %v3189_v2 = vld [vmem:[%s3881_s24 + $0x2] ss:$0 sm:$0xff] }
 0x518   : > { %v1506_v8 = vpack.c.bf16 %v1434_v3, %v1434_v3  ;;  %3439 = vmatprep.subr.bf16.mxu0 %v3739_v18  ;;  %v1507_v11 = vpack.c.bf16 %v1497_v4, %v1497_v4 }
 0x519   : > { %v1499_v9 = vpop.f32.mrf.mxu1 }
 0x51a   : > { %v1559_v10 = vsel %vm1084_vm3, %v1506_v8, 0  ;;  %v1500_v12 = vadd.f32 %v3165_v61, %v1499_v9  ;;  %v1629_v16 = vsel %vm1204_vm4, %v1507_v11, 0  ;;  %v3198_v8 = vld [vmem:[%s3891_s22 + $0x2] ss:$0 sm:$0xff] }
 0x51b   : > { %v3426_v13 = vpop.f32.mrf.mxu1  ;;  %3434 = vmatpush3.bf16.xpose.msra.mxu1 %v1559_v10  ;;  %v3180_v10 = vld [vmem:[%s4330_s25 + $0x2] ss:$0 sm:$0xff] }
 0x51c   : > { %3445 = vmatprep.subr.bf16.mxu1 %v3739_v18  ;;  %v1508_v17 = vpack.c.bf16 %v1500_v12, %v1500_v12 }
 0x51e   : > { %3430 = vmatmul.mubr.msk.bf16.vlgmr.msra.gmra.mxu0 %vm1084_vm3, %v1503_v14  ;;  %v1675_v20 = vsel %vm1204_vm4, %v1508_v17, 0 }
 0x51f   : > { %3440 = vmatpush3.bf16.msra.mxu0 %v1629_v16  ;;  %3441 = vmatprep.mubr.msk.bf16.mxu0 %vm3740_vm2, %v3739_v18 }
 0x520   : > { %3451 = vmatprep.subr.bf16.mxu0 %v3739_v18 }
 0x522   : > { %3436 = vmatmul.mubr.msk.bf16.vlgmr.msra.gmra.mxu1 %vm1084_vm3, %v1504_v19 }
 0x523   : > { %3446 = vmatpush3.bf16.msra.mxu1 %v1675_v20  ;;  %3447 = vmatprep.mubr.msk.bf16.mxu1 %vm3740_vm2, %v3739_v18 }
 0x524   : > { %3459 = vmatprep.subr.bf16.mxu1 %v3739_v18 }
 0x5de   : > { %v1549_v21 = vpop.f32.mrf.mxu0 }
 0x5df   : > { %v1601_v22 = vsel %vm1084_vm3, %v1549_v21, -inf }
 0x5e0   : > { %1602 = vmax.xlane.f32.xlu1 %v1601_v22  ;;  %v3431_v23 = vpop.f32.mrf.mxu0 }
 0x5e2   : > { %v1552_v24 = vpop.f32.mrf.mxu0  ;;  %v1595_v25 = vpop.f32.mrf.mxu1 }
 0x5e3   : > { %v1604_v26 = vsel %vm1084_vm3, %v1595_v25, -inf }
 0x5e4   : > { %v3432_v27 = vpop.f32.mrf.mxu0  ;;  %1605 = vmax.xlane.f32.xlu0 %v1604_v26  ;;  %v3437_v28 = vpop.f32.mrf.mxu1 }
 0x5e6   : > { %v1598_v29 = vpop.f32.mrf.mxu1 }
 0x5e8   : > { %v3438_v30 = vpop.f32.mrf.mxu1 }
 0x669   : > { %v1603_v31 = vpop.xlane.xlu1 %1602 }
 0x66a   : > { %v1607_v32 = vsub.f32 %v1549_v21, %v1603_v31 }
 0x66c   : > { %v1609_v33 = vmul.f32 1.442695, %v1607_v32 }
 0x66d   : > { %v1606_v34 = vpop.xlane.xlu0 %1605 }
 0x66e   : > { %3657 = vpow2.f32 %v1609_v33  ;;  %v1608_v35 = vsub.f32 %v1595_v25, %v1606_v34 }
 0x670   : > { %v1611_v36 = vmul.f32 1.442695, %v1608_v35 }
 0x672   : > { %3659 = vpow2.f32 %v1611_v36 }
 0x67b   : > { %v3658_v37 = vpop.eup %3657 }
 0x67c   : > { %v1613_v39 = vsel %vm1084_vm3, %v3658_v37, 0.0 }
 0x67d   : > { %1614 = vadd.xlane.f32.xlu1 %v1613_v39 }
 0x67f   : > { %v3660_v40 = vpop.eup %3659 }
 0x680   : > { %v1616_v41 = vsel %vm1084_vm3, %v3660_v40, 0.0 }
 0x681   : > { %1617 = vadd.xlane.f32.xlu0 %v1616_v41 }
 0x706   : > { %v1615_v42 = vpop.xlane.xlu1 %1614 }
 0x707   : > { %3661 = vrcp.f32 %v1615_v42 }
 0x70a   : > { %v1618_v43 = vpop.xlane.xlu0 %1617 }
 0x70b   : > { %3663 = vrcp.f32 %v1618_v43 }
 0x714   : > { %v3662_v44 = vpop.eup %3661 }
 0x715   : > { %v1621_v45 = vmul.f32 %v3662_v44, %v3658_v37 }
 0x717   : > { %v1623_v47 = vpack.c.bf16 %v1621_v45, %v1621_v45 }
 0x718   : > { %v3664_v48 = vpop.eup %3663 }
 0x719   : > { %3442 = vmatmul.mubr.msk.bf16.vlgmr.msra.gmra.mxu0 %vm1084_vm3, %v1623_v47  ;;  %v1622_v49 = vmul.f32 %v3664_v48, %v3660_v40 }
 0x71a   : > { %3452 = vmatpush3.bf16.msra.mxu0 %v3624_v46  ;;  %3455 = vmatprep.mubr.msk.bf16.mxu0 %vm3740_vm2, %v3739_v18 }
 0x71b   : > { %v1624_v52 = vpack.c.bf16 %v1622_v49, %v1622_v49  ;;  %3453 = vmatprep.subr.bf16.mxu0 %v3739_v18 }
 0x71d   : > { %3448 = vmatmul.mubr.msk.bf16.vlgmr.msra.gmra.mxu1 %vm1084_vm3, %v1624_v52 }
 0x71e   : > { %3454 = vmatpush3.bf16.msra.mxu0 %v3625_v50  ;;  %3460 = vmatpush3.bf16.msra.mxu1 %v3626_v51 }
 0x71f   : > { %3461 = vmatprep.subr.bf16.mxu1 %v3739_v18  ;;  %3467 = vmatprep.subr.bf16.mxu0 %v3739_v18 }
 0x720   : > { %3463 = vmatprep.mubr.msk.bf16.mxu1 %vm3740_vm2, %v3739_v18 }
 0x721   : > { %3456 = vmatmul.mubr.msk.bf16.vlgmr.msra.gmra.mxu0 %vm838_vm1, %v3974_v38 }
 0x722   : > { %3462 = vmatpush3.bf16.msra.mxu1 %v3627_v53  ;;  %3468 = vmatpush3.bf16.msra.mxu0 %v3628_v54 }
 0x723   : > { %3469 = vmatprep.subr.bf16.mxu0 %v3739_v18  ;;  %3471 = vmatprep.mubr.msk.bf16.mxu0 %vm3740_vm2, %v3739_v18 }
 0x724   : > { %3475 = vmatprep.subr.bf16.mxu1 %v3739_v18 }
 0x725   : > { %3464 = vmatmul.mubr.msk.bf16.vlgmr.msra.gmra.mxu1 %vm838_vm1, %v3974_v38 }
 0x726   : > { %3470 = vmatpush3.bf16.msra.mxu0 %v3629_v55  ;;  %3477 = vmatprep.mubr.msk.bf16.mxu1 %vm3740_vm2, %v3739_v18 }
 0x727   : > { %3481 = vmatprep.subr.bf16.mxu0 %v3739_v18 }
 0x729   : > { %3472 = vmatmul.mubr.msk.bf16.vlgmr.msra.gmra.mxu0 %vm838_vm1, %v3974_v38 }
 0x72a   : > { %3483 = vmatprep.mubr.msk.bf16.mxu0 %vm3740_vm2, %v3739_v18 }
 0x7d9   : > { %v4093_v56 = vpop.f32.mrf.mxu0 }
 0x7db   : > { %v3443_v57 = vpop.f32.mrf.mxu0 }
 0x7dd   : > { %v1668_v58 = vpop.f32.mrf.mxu0  ;;  %v4095_v59 = vpop.f32.mrf.mxu1 }
 0x7de   : > { %v3630_v58 = vld [vmem:[%s4326_s0 + $0x38] sm:$0xff]  }
 0x7df   : > { %v3444_v60 = vpop.f32.mrf.mxu0  ;;  %v3449_v61 = vpop.f32.mrf.mxu1 }
 0x7e1   : > { %v1714_v62 = vpop.f32.mrf.mxu1  ;;  %v1791_v63 = vpop.f32.mrf.mxu0 }
 0x7e2   : > { %v1792_v19 = vadd.f32 %v3180_v10, %v1791_v63  ;;  %v3631_v63 = vld [vmem:[%s4326_s0 + $0x30] sm:$0xff]  }
 0x7e3   : > { %v3450_v0 = vpop.f32.mrf.mxu1  ;;  %v3457_v1 = vpop.f32.mrf.mxu0 }
 0x7e4   : > { %v1930_v26 = vpack.c.bf16 %v1792_v19, %v1792_v19  ;;  %v3632_v0 = vld [vmem:[%s4327_s18 + $0x38] sm:$0xff]  }
 0x7e5   : > { %v1794_v3 = vpop.f32.mrf.mxu0  ;;  %v1857_v4 = vpop.f32.mrf.mxu1 }
 0x7e6   : > { %v1858_v5 = vadd.f32 %v3189_v2, %v1857_v4  ;;  %v1795_v27 = vadd.f32 %v3180_v10, %v1794_v3  ;;  %v3634_v3 = vld [vmem:[%s3886_s1 + $0x38] sm:$0xff]   ;;  %v3635_v4 = vld [vmem:[%s3886_s1 + $0x30] sm:$0xff]   ;;  %s3742_s1 = smov 16  }
 0x7e7   : > { %v3458_v6 = vpop.f32.mrf.mxu0  ;;  %v3465_v7 = vpop.f32.mrf.mxu1 }
 0x7e8   : > { %v1932_v9 = vpack.c.bf16 %v1858_v5, %v1858_v5  ;;  %v1931_v30 = vpack.c.bf16 %v1795_v27, %v1795_v27 }
 0x7e9   : > { %v1860_v11 = vpop.f32.mrf.mxu1  ;;  %v1923_v12 = vpop.f32.mrf.mxu0 }
 0x7ea   : > { %v1940_v13 = vsel %vm1084_vm3, %v1932_v9, 0  ;;  %v1861_v14 = vadd.f32 %v3189_v2, %v1860_v11  ;;  %v1924_v15 = vadd.f32 %v3198_v8, %v1923_v12  ;;  %v3633_v2 = vld [vmem:[%s4327_s18 + $0x30] sm:$0xff]  }
 0x7eb   : > { %v3466_v16 = vpop.f32.mrf.mxu1  ;;  %v3473_v17 = vpop.f32.mrf.mxu0  ;;  %3476 = vmatpush3.bf16.xpose.msra.mxu1 %v1940_v13 }
 0x7ec   : > { %v1933_v20 = vpack.c.bf16 %v1861_v14, %v1861_v14  ;;  %3487 = vmatprep.subr.bf16.mxu1 %v3739_v18  ;;  %v1934_v23 = vpack.c.bf16 %v1924_v15, %v1924_v15  ;;  %v3222_v15 = vld [vmem:[%s3881_s24 + $0x3] ss:$0 sm:$0xff]  ;;  %s3741_s24 = smov 8  }
 0x7ed   : > { %v1926_v21 = vpop.f32.mrf.mxu0 }
 0x7ee   : > { %v1986_v22 = vsel %vm1084_vm3, %v1933_v20, 0  ;;  %v1927_v24 = vadd.f32 %v3198_v8, %v1926_v21  ;;  %v2056_v28 = vsel %vm1204_vm4, %v1934_v23, 0  ;;  %v3231_v21 = vld [vmem:[%s3891_s22 + $0x3] ss:$0 sm:$0xff]  ;;  %s3743_s22 = smov 24  }
 0x7ef   : > { %v3474_v25 = vpop.f32.mrf.mxu0  ;;  %3482 = vmatpush3.bf16.xpose.msra.mxu0 %v1986_v22  ;;  %v3213_v23 = vld [vmem:[%s4330_s25 + $0x3] ss:$0 sm:$0xff]  ;;  %s4334_s25 = sadd.s32 4294967295, %s4333_s27  }
 0x7f0   : > { %3493 = vmatprep.subr.bf16.mxu0 %v3739_v18  ;;  %v1935_v29 = vpack.c.bf16 %v1927_v24, %v1927_v24  ;;  %p4248_p6 = scmp.eq.s32.totalorder %s4334_s25, 1 }
 0x7f2   : > { %3478 = vmatmul.mubr.msk.bf16.vlgmr.msra.gmra.mxu1 %vm1084_vm3, %v1930_v26  ;;  %v2102_v31 = vsel %vm1204_vm4, %v1935_v29, 0 }
 0x7f3   : > { %3488 = vmatpush3.bf16.msra.mxu1 %v2056_v28  ;;  %3489 = vmatprep.mubr.msk.bf16.mxu1 %vm3740_vm2, %v3739_v18 }
 0x7f4   : > { %3499 = vmatprep.subr.bf16.mxu1 %v3739_v18 }
 0x7f6   : > { %3484 = vmatmul.mubr.msk.bf16.vlgmr.msra.gmra.mxu0 %vm1084_vm3, %v1931_v30 }
 0x7f7   : > { %3494 = vmatpush3.bf16.msra.mxu0 %v2102_v31  ;;  %3495 = vmatprep.mubr.msk.bf16.mxu0 %vm3740_vm2, %v3739_v18 }
 0x7f8   : > { %3507 = vmatprep.subr.bf16.mxu0 %v3739_v18 }
 0x8b2   : > { %v1976_v32 = vpop.f32.mrf.mxu1 }
 0x8b3   : > { %v2028_v33 = vsel %vm1084_vm3, %v1976_v32, -inf }
 0x8b4   : > { %2029 = vmax.xlane.f32.xlu1 %v2028_v33  ;;  %v3479_v34 = vpop.f32.mrf.mxu1 }
 0x8b6   : > { %v1979_v35 = vpop.f32.mrf.mxu1  ;;  %v2022_v36 = vpop.f32.mrf.mxu0 }
 0x8b7   : > { %v2031_v37 = vsel %vm1084_vm3, %v2022_v36, -inf }
 0x8b8   : > { %2032 = vmax.xlane.f32.xlu0 %v2031_v37  ;;  %v3480_v39 = vpop.f32.mrf.mxu1  ;;  %v3485_v40 = vpop.f32.mrf.mxu0 }
 0x8ba   : > { %v2025_v41 = vpop.f32.mrf.mxu0 }
 0x8bc   : > { %v3486_v42 = vpop.f32.mrf.mxu0 }
 0x93d   : > { %v2030_v43 = vpop.xlane.xlu1 %2029 }
 0x93e   : > { %v2034_v44 = vsub.f32 %v1976_v32, %v2030_v43 }
 0x940   : > { %v2036_v45 = vmul.f32 1.442695, %v2034_v44 }
 0x941   : > { %v2033_v46 = vpop.xlane.xlu0 %2032 }
 0x942   : > { %3665 = vpow2.f32 %v2036_v45  ;;  %v2035_v47 = vsub.f32 %v2022_v36, %v2033_v46 }
 0x944   : > { %v2038_v48 = vmul.f32 1.442695, %v2035_v47 }
 0x946   : > { %3667 = vpow2.f32 %v2038_v48 }
 0x94f   : > { %v3666_v49 = vpop.eup %3665 }
 0x950   : > { %v2040_v50 = vsel %vm1084_vm3, %v3666_v49, 0.0 }
 0x951   : > { %2041 = vadd.xlane.f32.xlu1 %v2040_v50 }
 0x953   : > { %v3668_v51 = vpop.eup %3667 }
 0x954   : > { %v2043_v52 = vsel %vm1084_vm3, %v3668_v51, 0.0 }
 0x955   : > { %2044 = vadd.xlane.f32.xlu0 %v2043_v52 }
 0x9da   : > { %v2042_v53 = vpop.xlane.xlu1 %2041 }
 0x9db   : > { %3669 = vrcp.f32 %v2042_v53 }
 0x9de   : > { %v2045_v54 = vpop.xlane.xlu0 %2044 }
 0x9df   : > { %3671 = vrcp.f32 %v2045_v54 }
 0x9e8   : > { %v3670_v55 = vpop.eup %3669 }
 0x9e9   : > { %v2048_v57 = vmul.f32 %v3670_v55, %v3666_v49 }
 0x9eb   : > { %v2050_v60 = vpack.c.bf16 %v2048_v57, %v2048_v57 }
 0x9ec   : > { %v3672_v61 = vpop.eup %3671 }
 0x9ed   : > { %3490 = vmatmul.mubr.msk.bf16.vlgmr.msra.gmra.mxu1 %vm1084_vm3, %v2050_v60  ;;  %v2049_v62 = vmul.f32 %v3672_v61, %v3668_v51 }
 0x9ee   : > { %3500 = vmatpush3.bf16.msra.mxu1 %v3630_v58  ;;  %3503 = vmatprep.mubr.msk.bf16.mxu1 %vm3740_vm2, %v3739_v18 }
 0x9ef   : > { %v2051_v1 = vpack.c.bf16 %v2049_v62, %v2049_v62  ;;  %3501 = vmatprep.subr.bf16.mxu1 %v3739_v18 }
 0x9f1   : > { %3496 = vmatmul.mubr.msk.bf16.vlgmr.msra.gmra.mxu0 %vm1084_vm3, %v2051_v1 }
 0x9f2   : > { %3502 = vmatpush3.bf16.msra.mxu1 %v3631_v63  ;;  %3508 = vmatpush3.bf16.msra.mxu0 %v3632_v0 }
 0x9f3   : > { %3509 = vmatprep.subr.bf16.mxu0 %v3739_v18  ;;  %3515 = vmatprep.subr.bf16.mxu1 %v3739_v18 }
 0x9f4   : > { %3511 = vmatprep.mubr.msk.bf16.mxu0 %vm3740_vm2, %v3739_v18 }
 0x9f5   : > { %3504 = vmatmul.mubr.msk.bf16.vlgmr.msra.gmra.mxu1 %vm838_vm1, %v3974_v38 }
 0x9f6   : > { %3510 = vmatpush3.bf16.msra.mxu0 %v3633_v2  ;;  %3516 = vmatpush3.bf16.msra.mxu1 %v3634_v3  ;;  %v3271_v3 = vpack.c.bf16 %v4095_v59, %v4095_v59 }
 0x9f7   : > { %3517 = vmatprep.subr.bf16.mxu1 %v3739_v18  ;;  %3519 = vmatprep.mubr.msk.bf16.mxu1 %vm3740_vm2, %v3739_v18 }
 0x9f8   : > { %3523 = vmatprep.subr.bf16.mxu0 %v3739_v18 }
 0x9f9   : > { %3512 = vmatmul.mubr.msk.bf16.vlgmr.msra.gmra.mxu0 %vm838_vm1, %v3974_v38 }
 0x9fa   : > { %3518 = vmatpush3.bf16.msra.mxu1 %v3635_v4  ;;  %3525 = vmatprep.mubr.msk.bf16.mxu0 %vm3740_vm2, %v3739_v18  ;;  %v3270_v4 = vpack.c.bf16 %v4093_v56, %v4093_v56 }
 0x9fb   : > { %3529 = vmatprep.subr.bf16.mxu1 %v3739_v18 }
 0x9fd   : > { %3520 = vmatmul.mubr.msk.bf16.vlgmr.msra.gmra.mxu1 %vm838_vm1, %v3974_v38 }
 0x9fe   : > { %3531 = vmatprep.mubr.msk.bf16.mxu1 %vm3740_vm2, %v3739_v18 }
 0xaad   : > { %v4148_v5 = vpop.f32.mrf.mxu1 }
 0xaaf   : > { %v3491_v6 = vpop.f32.mrf.mxu1 }
 0xab0   : > { %v3272_v6 = vpack.c.bf16 %v4148_v5, %v4148_v5 }
 0xab1   : > { %v2095_v7 = vpop.f32.mrf.mxu1  ;;  %v4150_v8 = vpop.f32.mrf.mxu0 }
 0xab2   : > { %v3273_v7 = vpack.c.bf16 %v4150_v8, %v4150_v8 }
 0xab3   : > { %v3492_v9 = vpop.f32.mrf.mxu1  ;;  %v3497_v10 = vpop.f32.mrf.mxu0 }
 0xab5   : > { %v2141_v11 = vpop.f32.mrf.mxu0  ;;  %v2218_v12 = vpop.f32.mrf.mxu1 }
 0xab6   : > { %v2219_v31 = vadd.f32 %v3213_v23, %v2218_v12 }
 0xab7   : > { %v3498_v13 = vpop.f32.mrf.mxu0  ;;  %v3505_v14 = vpop.f32.mrf.mxu1 }
 0xab8   : > { %v2357_v39 = vpack.c.bf16 %v2219_v31, %v2219_v31 }
 0xab9   : > { %v2221_v16 = vpop.f32.mrf.mxu1  ;;  %v2284_v38 = vpop.f32.mrf.mxu0 }
 0xaba   : > { %v2285_v17 = vadd.f32 %v3222_v15, %v2284_v38  ;;  %v2222_v40 = vadd.f32 %v3213_v23, %v2221_v16  ;;  %v3636_v38 = vld [vmem:[%s3901_s17 + $0x8] sm:$0xff]  }
 0xabb   : > { %v3506_v19 = vpop.f32.mrf.mxu1  ;;  %v3513_v20 = vpop.f32.mrf.mxu0 }
 0xabc   : > { %v2359_v22 = vpack.c.bf16 %v2285_v17, %v2285_v17  ;;  %v2358_v43 = vpack.c.bf16 %v2222_v40, %v2222_v40  ;;  %v3637_v17 = vld [vmem:[%s3901_s17] sm:$0xff]  }
 0xabd   : > { %v2287_v24 = vpop.f32.mrf.mxu0  ;;  %v2350_v25 = vpop.f32.mrf.mxu1 }
 0xabe   : > { %v2367_v26 = vsel %vm1084_vm3, %v2359_v22, 0  ;;  %v2288_v27 = vadd.f32 %v3222_v15, %v2287_v24  ;;  %v2351_v28 = vadd.f32 %v3231_v21, %v2350_v25 }
 0xabf   : > { %v3514_v29 = vpop.f32.mrf.mxu0  ;;  %v3521_v30 = vpop.f32.mrf.mxu1  ;;  %3524 = vmatpush3.bf16.xpose.msra.mxu0 %v2367_v26 }
 0xac0   : > { %v2360_v32 = vpack.c.bf16 %v2288_v27, %v2288_v27  ;;  %3535 = vmatprep.subr.bf16.mxu0 %v3739_v18  ;;  %v2361_v35 = vpack.c.bf16 %v2351_v28, %v2351_v28 }
 0xac1   : > { %v2353_v33 = vpop.f32.mrf.mxu1 }
 0xac2   : > { %v2413_v34 = vsel %vm1084_vm3, %v2360_v32, 0  ;;  %v2354_v36 = vadd.f32 %v3231_v21, %v2353_v33  ;;  %v2483_v41 = vsel %vm1204_vm4, %v2361_v35, 0  ;;  %v3241_v32 = vld [vmem:[%s4331_s4] ss:$0 sm:$0xff] }
 0xac3   : > { %v3522_v37 = vpop.f32.mrf.mxu1  ;;  %3530 = vmatpush3.bf16.xpose.msra.mxu1 %v2413_v34 }
 0xac4   : > { %3541 = vmatprep.subr.bf16.mxu1 %v3739_v18  ;;  %v2362_v42 = vpack.c.bf16 %v2354_v36, %v2354_v36  ;;  %v3685_v36 = vld [vmem:[#allocation3] sm:$0xff] }
 0xac6   : > { %3526 = vmatmul.mubr.msk.bf16.vlgmr.msra.gmra.mxu0 %vm1084_vm3, %v2357_v39  ;;  %v2529_v44 = vsel %vm1204_vm4, %v2362_v42, 0 }
 0xac7   : > { %3536 = vmatpush3.bf16.msra.mxu0 %v2483_v41  ;;  %3537 = vmatprep.mubr.msk.bf16.mxu0 %vm3740_vm2, %v3739_v18 }
 0xac8   : > { %3547 = vmatprep.subr.bf16.mxu0 %v3739_v18 }
 0xaca   : > { %3532 = vmatmul.mubr.msk.bf16.vlgmr.msra.gmra.mxu1 %vm1084_vm3, %v2358_v43  ;;  %v3686_v43 = vld [vmem:[#allocation3 + $0x8] sm:$0xff] }
 0xacb   : > { %3542 = vmatpush3.bf16.msra.mxu1 %v2529_v44  ;;  %3543 = vmatprep.mubr.msk.bf16.mxu1 %vm3740_vm2, %v3739_v18 }
 0xacc   : > { %3555 = vmatprep.subr.bf16.mxu1 %v3739_v18 }
 0xb86   : > { %v2403_v45 = vpop.f32.mrf.mxu0 }
 0xb87   : > { %v2455_v46 = vsel %vm1084_vm3, %v2403_v45, -inf }
 0xb88   : > { %2456 = vmax.xlane.f32.xlu0 %v2455_v46  ;;  %v3527_v47 = vpop.f32.mrf.mxu0 }
 0xb8a   : > { %v2406_v48 = vpop.f32.mrf.mxu0  ;;  %v2449_v49 = vpop.f32.mrf.mxu1 }
 0xb8b   : > { %v2458_v50 = vsel %vm1084_vm3, %v2449_v49, -inf }
 0xb8c   : > { %v3528_v51 = vpop.f32.mrf.mxu0  ;;  %2459 = vmax.xlane.f32.xlu1 %v2458_v50  ;;  %v3533_v52 = vpop.f32.mrf.mxu1 }
 0xb8e   : > { %v2452_v53 = vpop.f32.mrf.mxu1 }
 0xb90   : > { %v3534_v54 = vpop.f32.mrf.mxu1 }
 0xc11   : > { %v2457_v55 = vpop.xlane.xlu0 %2456 }
 0xc12   : > { %v2461_v57 = vsub.f32 %v2403_v45, %v2457_v55 }
 0xc14   : > { %v2463_v58 = vmul.f32 1.442695, %v2461_v57  ;;  %v3639_v57 = vld [vmem:[%s3922_s23 + $0x8] sm:$0xff]  }
 0xc15   : > { %v2460_v60 = vpop.xlane.xlu1 %2459 }
 0xc16   : > { %3673 = vpow2.f32 %v2463_v58  ;;  %v2462_v61 = vsub.f32 %v2449_v49, %v2460_v60  ;;  %v3640_v58 = vld [vmem:[%s3922_s23] sm:$0xff]   ;;  %v3641_v60 = vld [vmem:[%s3932_s20 + $0x18] sm:$0xff]  }
 0xc18   : > { %v2465_v62 = vmul.f32 1.442695, %v2462_v61 }
 0xc1a   : > { %3675 = vpow2.f32 %v2465_v62 }
 0xc23   : > { %v3674_v63 = vpop.eup %3673 }
 0xc24   : > { %v2467_v0 = vsel %vm1084_vm3, %v3674_v63, 0.0 }
 0xc25   : > { %2468 = vadd.xlane.f32.xlu0 %v2467_v0 }
 0xc27   : > { %v3676_v1 = vpop.eup %3675 }
 0xc28   : > { %v2470_v2 = vsel %vm1084_vm3, %v3676_v1, 0.0 }
 0xc29   : > { %2471 = vadd.xlane.f32.xlu1 %v2470_v2 }
 0xc3a   : > { %1725 = vrot.lane.b32.xlu1 %v3271_v3, %s3741_s24 }
 0xc3b   : > { %1723 = vrot.lane.b32.xlu0 %v3270_v4, %s3741_s24 }
 0xc3e   : > { %2150 = vrot.lane.b32.xlu1 %v3272_v6, %s3742_s1  ;;  %v3246_v6 = vld [vmem:[%s803_s5] ss:$0 sm:$0xff] }
 0xc42   : > { %2152 = vrot.lane.b32.xlu1 %v3273_v7, %s3742_s1 }
 0xcae   : > { %v2469_v9 = vpop.xlane.xlu0 %2468 }
 0xcaf   : > { %3677 = vrcp.f32 %v2469_v9 }
 0xcb2   : > { %v1724_v59 = vpop.permute.xlu0 %1723  ;;  %v2472_v10 = vpop.xlane.xlu1 %2471 }
 0xcb3   : > { %1730 = vst.msk [vmem:[#allocation2] sm:$0xf] %vm1729_vm6, %v1724_v59  ;;  %3679 = vrcp.f32 %v2472_v10  ;;  %v3247_v10 = vld [vmem:[%s4332_s30] ss:$0 sm:$0xff] }
 0xcb6   : > { %v1726_v56 = vpop.permute.xlu1 %1725 }
 0xcb7   : > { %1731 = vst.msk [vmem:[#allocation2 + $0x4] sm:$0xf] %vm1729_vm6, %v1726_v56 }
 0xcba   : > { %v2151_v11 = vpop.permute.xlu1 %2150 }
 0xcbb   : > { %2157 = vst.msk [vmem:[#allocation2] sm:$0xf] %vm2156_vm7, %v2151_v11 }
 0xcbc   : > { %v3678_v5 = vpop.eup %3677 }
 0xcbd   : > { %v2475_v12 = vmul.f32 %v3678_v5, %v3674_v63 }
 0xcbe   : > { %v2153_v13 = vpop.permute.xlu1 %2152 }
 0xcbf   : > { %2158 = vst.msk [vmem:[#allocation2 + $0x4] sm:$0xf] %vm2156_vm7, %v2153_v13  ;;  %v2477_v8 = vpack.c.bf16 %v2475_v12, %v2475_v12  ;;  %v3642_v13 = vld [vmem:[%s3932_s20 + $0x10] sm:$0xff]  }
 0xcc0   : > { %v3680_v14 = vpop.eup %3679 }
 0xcc1   : > { %3538 = vmatmul.mubr.msk.bf16.vlgmr.msra.gmra.mxu0 %vm1084_vm3, %v2477_v8  ;;  %v2476_v15 = vmul.f32 %v3680_v14, %v3676_v1  ;;  %v3643_v8 = vld [vmem:[%s3932_s20 + $0x8] sm:$0xff]   ;;  %v3644_v14 = vld [vmem:[%s3932_s20] sm:$0xff]  }
 0xcc2   : > { %3551 = vmatprep.mubr.msk.bf16.mxu0 %vm3740_vm2, %v3739_v18  ;;  %3548 = vmatpush3.bf16.msra.mxu0 %v3636_v38 }
 0xcc3   : > { %v2478_v16 = vpack.c.bf16 %v2476_v15, %v2476_v15  ;;  %3549 = vmatprep.subr.bf16.mxu0 %v3739_v18  ;;  %v3248_v15 = vld [vmem:[%s814_s26] ss:$0 sm:$0xff]  ;;  %s3744_s26 = smov [#allocation3]  }
 0xcc4   : > { %s2874_s2 = sshll.u32 %s3744_s26, 4  ;;  %s2875_s2 = int_to_ptr.vmem [resolvable:$true] %s2874_s2 }
 0xcc5   : > { %3544 = vmatmul.mubr.msk.bf16.vlgmr.msra.gmra.mxu1 %vm1084_vm3, %v2478_v16  ;;  %s3687_s29 = scalar_lea.vmem %s2875_s2, 256  ;;  %p3694_p10 = scmp.lt.s32.totalorder %s2875_s2, %s2875_s2 }
 0xcc6   : > { %3559 = vmatprep.mubr.msk.bf16.mxu1 %vm3740_vm2, %v3739_v18  ;;  %3550 = vmatpush3.bf16.msra.mxu0 %v3637_v17  ;;  %p3688_p7 = scmp.ne.s32.totalorder %s2875_s2, %s3687_s29  ;;  %p3695_p11 = scmp.lt.s32.totalorder %s3687_s29, %s3687_s29 }
 0xcc7   : > { %3563 = vmatprep.subr.bf16.mxu0 %v3739_v18  ;;  %3556 = vmatpush3.bf16.msra.mxu1 %v3639_v57 }
 0xcc8   : > { %3557 = vmatprep.subr.bf16.mxu1 %v3739_v18  ;;  %p3689_p8 = pnand %p3688_p7, %p4248_p6  ;;  %p3696_p12 = por %p3695_p11, %p3694_p10 }
 0xcca   : > { %p3690_p9 = pneg %p3689_p8 }
 0xccb   : > { %3558 = vmatpush3.bf16.msra.mxu1 %v3640_v58 }
 0xccc   : > { %p3697_p13 = pnand %p3696_p12, %p3690_p9 }
 0xd81   : > { %v2519_v19 = vpop.f32.mrf.mxu0 }
 0xd82   : > { %v3274_v20 = vpack.c.bf16 %v2519_v19, %v2519_v19 }
 0xd83   : > { %v3539_v21 = vpop.f32.mrf.mxu0 }
 0xd84   : > { %2577 = vrot.lane.b32.xlu0 %v3274_v20, %s3743_s22 }
 0xd85   : > { %v2522_v22 = vpop.f32.mrf.mxu0  ;;  %v2565_v23 = vpop.f32.mrf.mxu1 }
 0xd86   : > { %v3275_v24 = vpack.c.bf16 %v2565_v23, %v2565_v23 }
 0xd87   : > { %v3540_v25 = vpop.f32.mrf.mxu0  ;;  %v3545_v26 = vpop.f32.mrf.mxu1 }
 0xd88   : > { %2579 = vrot.lane.b32.xlu1 %v3275_v24, %s3743_s22 }
 0xd89   : > { %v2568_v27 = vpop.f32.mrf.mxu1 }
 0xd8b   : > { %v3546_v28 = vpop.f32.mrf.mxu1 }
 0xdf6   : > { %v2578_v29 = vpop.permute.xlu0 %2577 }
 0xdf7   : > { %2584 = vst.msk [vmem:[#allocation2] sm:$0xf] %vm2583_vm8, %v2578_v29 }
 0xdfa   : > { %v2580_v30 = vpop.permute.xlu1 %2579 }
 0xdfb   : > { %2585 = vst.msk [vmem:[#allocation2 + $0x4] sm:$0xf] %vm2583_vm8, %v2580_v30 }
 0xe02   : > { %v3638_v31 = vld [vmem:[#allocation2] sm:$0xff]  }
 0xe03   : > { %3552 = vmatmul.mubr.msk.bf16.vlgmr.msra.gmra.mxu0 %vm838_vm1, %v3638_v31 }
 0xe04   : > { %3571 = vmatprep.mubr.msk.bf16.mxu0 %vm3740_vm2, %v3739_v18  ;;  %3564 = vmatpush3.bf16.msra.mxu0 %v3641_v60 }
 0xe05   : > { %3565 = vmatprep.subr.bf16.mxu0 %v3739_v18 }
 0xe08   : > { %3566 = vmatpush3.bf16.msra.mxu0 %v3642_v13 }
 0xe09   : > { %3567 = vmatprep.subr.bf16.mxu0 %v3739_v18 }
 0xe0c   : > { %3568 = vmatpush3.bf16.msra.mxu0 %v3643_v8 }
 0xe0d   : > { %3569 = vmatprep.subr.bf16.mxu0 %v3739_v18  ;;  %v3252_v18 = vld [vmem:[%s822_s6] ss:$0 sm:$0xff] }
 0xe10   : > { %3570 = vmatpush3.bf16.msra.mxu0 %v3644_v14 }
 0xec3   : > { %v2653_v33 = vpop.f32.mrf.mxu0 }
 0xec4   : > { %v2654_v34 = vadd.f32 %v3241_v32, %v2653_v33 }
 0xec5   : > { %v3553_v35 = vpop.f32.mrf.mxu0 }
 0xec6   : > { %v4201_v37 = vadd.f32 %v3685_v36, %v2654_v34 }
 0xec7   : > { %v2656_v39 = vpop.f32.mrf.mxu0 }
 0xec8   : > { %v2657_v40 = vadd.f32 %v3241_v32, %v2656_v39  ;;  %v2664_v41 = vsel %vm838_vm1, %v4201_v37, 0.0 }
 0xec9   : > { %2665 = vadd.xlane.f32.xlu0 %v2664_v41  ;;  %v3554_v42 = vpop.f32.mrf.mxu0 }
 0xeca   : > { %v4205_v44 = vadd.f32 %v3686_v43, %v2657_v40 }
 0xecc   : > { %v2667_v45 = vsel %vm838_vm1, %v4205_v44, 0.0 }
 0xecd   : > { %2668 = vadd.xlane.f32.xlu1 %v2667_v45 }
 0xf52   : > { %v2666_v46 = vpop.xlane.xlu0 %2665 }
 0xf53   : > { %v2670_v47 = vmul.f32 0.03125, %v2666_v46 }
 0xf55   : > { %v2672_v48 = vsub.f32 %v4201_v37, %v2670_v47 }
 0xf56   : > { %v2669_v49 = vpop.xlane.xlu1 %2668 }
 0xf57   : > { %v2671_v50 = vmul.f32 0.03125, %v2669_v49  ;;  %v2674_v51 = vmul.f32 %v2672_v48, %v2672_v48 }
 0xf59   : > { %v2673_v52 = vsub.f32 %v4205_v44, %v2671_v50  ;;  %v2676_v53 = vsel %vm838_vm1, %v2674_v51, 0.0 }
 0xf5a   : > { %2677 = vadd.xlane.f32.xlu0 %v2676_v53 }
 0xf5b   : > { %v2675_v54 = vmul.f32 %v2673_v52, %v2673_v52 }
 0xf5d   : > { %v2679_v55 = vsel %vm838_vm1, %v2675_v54, 0.0 }
 0xf5e   : > { %2680 = vadd.xlane.f32.xlu0 %v2679_v55 }
 0xfe3   : > { %v2678_v61 = vpop.xlane.xlu0 %2677 }
 0xfe4   : > { %v2682_v62 = vmul.f32 0.03125, %v2678_v61 }
 0xfe6   : > { %v2684_v63 = vadd.f32 1e-05, %v2682_v62 }
 0xfe7   : > { %v2681_v0 = vpop.xlane.xlu0 %2680 }
 0xfe8   : > { %3681 = vrsqrt.f32 %v2684_v63  ;;  %v2683_v1 = vmul.f32 0.03125, %v2681_v0 }
 0xfea   : > { %v2685_v2 = vadd.f32 1e-05, %v2683_v1 }
 0xfec   : > { %3683 = vrsqrt.f32 %v2685_v2 }
 0xff5   : > { %v3682_v3 = vpop.eup %3681 }
 0xff6   : > { %v2688_v4 = vmul.f32 %v3682_v3, %v2672_v48 }
 0xff8   : > { %v2696_v59 = vmul.f32 %v3246_v6, %v2688_v4 }
 0xff9   : > { %v3684_v7 = vpop.eup %3683 }
 0xffa   : > { %v2689_v9 = vmul.f32 %v3684_v7, %v2673_v52  ;;  %v2704_v11 = vadd.f32 %v3247_v10, %v2696_v59 }
 0xffc   : > { %v2697_v56 = vmul.f32 %v3246_v6, %v2689_v9 }
 0xffe   : > { %v2705_v5 = vadd.f32 %v3247_v10, %v2697_v56 }
0x1000   : > { %v2706_v12 = vpack.c.bf16 %v2705_v5, %v2704_v11 }
0x1002   : > { %3560 = vmatmul.mubr.msk.bf16.vlgmr.msra.gmra.mxu1 %vm838_vm1, %v2706_v12 }
0x10c2   : > { %v2767_v16 = vpop.f32.mrf.mxu1 }
0x10c3   : > { %v2768_v17 = vadd.f32 %v3248_v15, %v2767_v16 }
0x10c4   : > { %v3561_v38 = vpop.f32.mrf.mxu1 }
0x10c5   : > { %v2774_v22 = vmax.f32 %v2768_v17, 0.0 }
0x10c6   : > { %v2770_v19 = vpop.f32.mrf.mxu1 }
0x10c7   : > { %v2771_v20 = vadd.f32 %v3248_v15, %v2770_v19 }
0x10c8   : > { %v3562_v21 = vpop.f32.mrf.mxu1 }
0x10c9   : > { %v2775_v23 = vmax.f32 %v2771_v20, 0.0 }
0x10cb   : > { %v2776_v24 = vpack.c.bf16 %v2775_v23, %v2774_v22 }
0x10cd   : > { %3572 = vmatmul.mubr.msk.bf16.vlgmr.msra.gmra.mxu0 %vm2816_vm9, %v2776_v24 }
0x118d   : > { %v2854_v25 = vpop.f32.mrf.mxu0 }
0x118e   : > { %v2855_v26 = vadd.f32 %v3252_v18, %v2854_v25 }
0x118f   : > { %v3573_v27 = vpop.f32.mrf.mxu0 }
0x1190   : > { %v2861_v28 = vadd.f32 %v2855_v26, %v4201_v37 }
0x1191   : > { %v2857_v29 = vpop.f32.mrf.mxu0 }
0x1192   : > { %2863 = vst.msk [vmem:[#allocation3] sm:$0xff] %vm838_vm1, %v2861_v28  ;;  %v2858_v30 = vadd.f32 %v3252_v18, %v2857_v29 }
0x1193   : > { %v3574_v31 = vpop.f32.mrf.mxu0 }
0x1194   : > { %v2862_v32 = vadd.f32 %v2858_v30, %v4205_v44 }
0x1196   : > { %2864 = vst.msk [vmem:[#allocation3 + $0x8] sm:$0xff] %vm838_vm1, %v2862_v32 }
0x1197   : > { %3700 = shalt.err (!%p3697_p13)
}
0x1198   : > { %s3745_s6 = smov 128   ;;  %s4336_s7 = sld [smem:[#allocation21_spill]] }
0x119e   : > { %3576 = dma.vmem_to_hbm [thread:$0]  (%p4248_p6), %s2875_s2, 256, %s4336_s7, [#allocation4], %s3745_s6, %s3745_s6, %s3741_s24  }
0x119f   : > { %3724 = dma.done.wait (%p4248_p6), [#allocation4], 256  }
0x11a0   : > { %3726 = vsyncadd (%p4248_p6), [#allocation4], 4294967040 }
0x11a1 PF: > { %s4337_s4 = sld [smem:[#allocation8_spill]] }
0x11a2   : > { %s4338_s24 = sld [smem:[#allocation7_spill]] }
0x11a3   : > { %s4339_s25 = sld [smem:[#allocation9_spill]] }
0x11a7   : > { %s28_s26 = sadd.s32 1, %s4337_s4  }
0x11a8   : > { %p25_p0 = scmp.ge.s32.totalorder %s28_s26, 4  }
0x11aa   :  { %27 = sbr.rel (!%p25_p0) target bundleno = 12 (0xc), region = 186 }
0x11af   :  { %2890 = vsyncpa [#allocation4], 1 }
0x11b0   :  { %2892 = vsyncpa [#allocation4 + $0x1], 1 }

</bundles_post_ra>
